<compile_context>
chip_gen: v7x
topology: tpu7x:2x2x1
jax: 0.10.0
libtpu: 0.0.40
codegen_flags: <defaults>
</compile_context>

<pallas_src>
import jax
import jax.numpy as jnp
from jax.experimental import pallas as pl
from jax.experimental.pallas import tpu as pltpu


# --------------------------------------------------------------------------------------
# Fused kernel: whole SAGE_edge2test forward up to the per-edge sigmoid probability.
# --------------------------------------------------------------------------------------
def sage_edge2_kernel(
    x_ref, ea_ref, gsrc_ref, gdst_ref, amean_ref,
    wpre_ref, bpre_ref,
    we1_ref, be1_ref, wl1_ref, bl1_ref, wr1_ref,
    whh1_ref, bhh1_ref,
    we2_ref, be2_ref, wl2_ref, bl2_ref, wr2_ref,
    whh2_ref, bhh2_ref,
    we3_ref, be3_ref, wl3_ref, bl3_ref, wr3_ref,
    woo_ref, boo_ref, woh_ref, boh_ref,
    bns_ref, bnb_ref,
    wpa_ref, wpb_ref, bpost_ref,
    o_ref,
):
    f32 = jnp.float32

    def mm(a, b):
        return jnp.dot(a, b, preferred_element_type=f32)

    def leaky(v):                       # LeakyReLU, default negative_slope=0.01
        return jnp.maximum(v, 0.01 * v)

    x = x_ref[...]                      # (N, Cin)
    ea = ea_ref[...]                    # (E, 1)   edge_attr
    gsrc = gsrc_ref[...]                # (E, N)   one-hot gather by edge_index[0]
    gdst = gdst_ref[...]                # (E, N)   one-hot gather by edge_index[1]
    amean = amean_ref[...]              # (N, E)   row-normalized scatter (mean aggr)

    def sage_conv(h, we_r, be_r, wl_r, bl_r, wr_r):
        # message: relu(x_j + lin_e(edge_attr)); lin_e is (1 -> C) so it is a broadcast.
        ef = ea * we_r[...] + be_r[...]                     # (E, C)
        msg = jnp.maximum(mm(gsrc, h) + ef, 0.0)            # gather-as-matmul + relu
        agg = mm(amean, msg)                                # mean aggregation as matmul
        # lin_l(agg) + lin_r(x)  (lin_r has no bias)
        return mm(agg, wl_r[...]) + bl_r[...] + mm(h, wr_r[...])

    # prelin + relu
    h = jnp.maximum(mm(x, wpre_ref[...]) + bpre_ref[...], 0.0)
    # conv1 -> relu -> lin_hh1 -> leakyrelu
    h = jnp.maximum(sage_conv(h, we1_ref, be1_ref, wl1_ref, bl1_ref, wr1_ref), 0.0)
    h = leaky(mm(h, whh1_ref[...]) + bhh1_ref[...])
    # conv2 -> relu -> lin_hh2 -> leakyrelu
    h = jnp.maximum(sage_conv(h, we2_ref, be2_ref, wl2_ref, bl2_ref, wr2_ref), 0.0)
    h = leaky(mm(h, whh2_ref[...]) + bhh2_ref[...])
    # conv3 -> relu -> lin_oo -> leakyrelu -> lin_oh
    h = jnp.maximum(sage_conv(h, we3_ref, be3_ref, wl3_ref, bl3_ref, wr3_ref), 0.0)
    h = leaky(mm(h, woo_ref[...]) + boo_ref[...])
    h = mm(h, woh_ref[...]) + boh_ref[...]
    # BatchNorm1d (eval mode, folded to scale/bias); dropout is identity in eval.
    h = h * bns_ref[...] + bnb_ref[...]
    h = leaky(h)

    # edge scoring: postlin(cat([x[src], x[dst]], 1)) == x[src]@Wa + x[dst]@Wb + b
    h_src = mm(gsrc, h)                                     # (E, H)
    h_dst = mm(gdst, h)                                     # (E, H)
    score = (jnp.sum(h_src * wpa_ref[...], axis=1, keepdims=True)
             + jnp.sum(h_dst * wpb_ref[...], axis=1, keepdims=True)
             + bpost_ref[...])                              # (E, 1)
    o_ref[...] = 1.0 / (1.0 + jnp.exp(-score))              # sigmoid


# --------------------------------------------------------------------------------------
# Wrapper
# --------------------------------------------------------------------------------------
def build_graph_mats(edge_index, num_nodes):
    """Dense one-hot gather matrices and mean-aggregation matrix from edge_index."""
    src = edge_index[0]
    dst = edge_index[1]
    g_src = jax.nn.one_hot(src, num_nodes, dtype=jnp.float32)   # (E, N)
    g_dst = jax.nn.one_hot(dst, num_nodes, dtype=jnp.float32)   # (E, N)
    deg = jnp.sum(g_dst, axis=0)                                # in-degree per node
    inv_deg = 1.0 / jnp.maximum(deg, 1.0)
    a_mean = g_dst.T * inv_deg[:, None]                         # (N, E)
    return g_src, g_dst, a_mean


def sage_edge2_pallas(x, edge_index, edge_attr, p, num_nodes):
    E = edge_attr.shape[0]
    assert E % 48 == 0, "the module's final reshape requires num_edges % 48 == 0"
    g_src, g_dst, a_mean = build_graph_mats(edge_index, num_nodes)

    vmem = pl.BlockSpec(memory_space=pltpu.MemorySpace.VMEM)
    args = [
        x, edge_attr, g_src, g_dst, a_mean,
        p["wpre"], p["bpre"],
        *p["c1"],
        p["whh1"], p["bhh1"],
        *p["c2"],
        p["whh2"], p["bhh2"],
        *p["c3"],
        p["woo"], p["boo"], p["woh"], p["boh"],
        p["bns"], p["bnb"],
        p["wpa"], p["wpb"], p["bpost"],
    ]
    edge_prob = pl.pallas_call(
        sage_edge2_kernel,
        out_shape=jax.ShapeDtypeStruct((E, 1), jnp.float32),
        in_specs=[vmem] * len(args),
        out_specs=vmem,
    )(*args)

    # Tail reshuffle of the module (tiny, 96 elements): reshape(-1,48), average the two
    # 24-wide halves, duplicate, reshape(-1,1).
    out = edge_prob.reshape(-1, 48)
    out_half = (out[:, :24] + out[:, 24:]) * 0.5
    return jnp.concatenate([out_half, out_half], axis=1).reshape(-1, 1)


# --------------------------------------------------------------------------------------
# Parameter construction (deterministic, synthetic; weights stored (in, out),
# biases stored as (1, C) rows, BN folded to scale/bias).
# --------------------------------------------------------------------------------------
def make_params(key, cin, hid, outc):
    keys = iter(jax.random.split(key, 64))

    def lin(k_in, k_out, scale=0.1, bias=True):
        w = scale * jax.random.normal(next(keys), (k_in, k_out), jnp.float32)
        b = scale * jax.random.normal(next(keys), (1, k_out), jnp.float32) if bias else None
        return w, b

    p = {}
    p["wpre"], p["bpre"] = lin(cin, hid)

    def conv(cin_l, cout_l):
        we, be = lin(1, cin_l)                 # lin_e: Linear(1, in_channels)
        wl, bl = lin(cin_l, cout_l)            # lin_l
        wr, _ = lin(cin_l, cout_l, bias=False)  # lin_r (no bias)
        return (we, be, wl, bl, wr)

    p["c1"] = conv(hid, hid)
    p["c2"] = conv(hid, hid)
    p["c3"] = conv(hid, outc)
    p["whh1"], p["bhh1"] = lin(hid, hid)
    p["whh2"], p["bhh2"] = lin(hid, hid)
    p["woo"], p["boo"] = lin(outc, outc)
    p["woh"], p["boh"] = lin(outc, hid)

    # BatchNorm1d(hidden), eval-mode fold: y = x * scale + bias
    gamma = 1.0 + 0.1 * jax.random.normal(next(keys), (hid,), jnp.float32)
    beta = 0.1 * jax.random.normal(next(keys), (hid,), jnp.float32)
    mean = 0.1 * jax.random.normal(next(keys), (hid,), jnp.float32)
    var = jnp.abs(jax.random.normal(next(keys), (hid,), jnp.float32)) + 0.5
    scale = gamma / jnp.sqrt(var + 1e-5)
    p["bns"] = scale.reshape(1, hid)
    p["bnb"] = (beta - mean * scale).reshape(1, hid)

    # postlin: Linear(2*hid, 1) split into the src-half / dst-half row vectors.
    wpost, bpost = lin(2 * hid, 1)
    p["wpa"] = wpost[:hid, 0].reshape(1, hid)
    p["wpb"] = wpost[hid:, 0].reshape(1, hid)
    p["bpost"] = bpost.reshape(1, 1)
    return p


# --------------------------------------------------------------------------------------
# Pure-JAX reference (independent formulation: real gather + segment-sum scatter)
# --------------------------------------------------------------------------------------
def sage_edge2_ref(x, edge_index, edge_attr, p, num_nodes):
    src, dst = edge_index[0], edge_index[1]
    E = edge_attr.shape[0]
    leaky = lambda v: jnp.where(v > 0, v, 0.01 * v)

    def sage(h, conv):
        we, be, wl, bl, wr = conv
        ef = edge_attr * we + be
        msg = jnp.maximum(h[src] + ef, 0.0)
        ssum = jax.ops.segment_sum(msg, dst, num_segments=num_nodes)
        deg = jax.ops.segment_sum(jnp.ones((E,), jnp.float32), dst, num_segments=num_nodes)
        agg = ssum / jnp.maximum(deg, 1.0)[:, None]
        return agg @ wl + bl + h @ wr

    h = jnp.maximum(x @ p["wpre"] + p["bpre"], 0.0)
    h = jnp.maximum(sage(h, p["c1"]), 0.0)
    h = leaky(h @ p["whh1"] + p["bhh1"])
    h = jnp.maximum(sage(h, p["c2"]), 0.0)
    h = leaky(h @ p["whh2"] + p["bhh2"])
    h = jnp.maximum(sage(h, p["c3"]), 0.0)
    h = leaky(h @ p["woo"] + p["boo"])
    h = h @ p["woh"] + p["boh"]
    h = h * p["bns"] + p["bnb"]
    h = leaky(h)
    score = (jnp.sum(h[src] * p["wpa"], axis=1, keepdims=True)
             + jnp.sum(h[dst] * p["wpb"], axis=1, keepdims=True)
             + p["bpost"])
    prob = jax.nn.sigmoid(score)
    out = prob.reshape(-1, 48)
    out_half = (out[:, :24] + out[:, 24:]) * 0.5
    return jnp.concatenate([out_half, out_half], axis=1).reshape(-1, 1)


if __name__ == "__main__":
    NUM_NODES, IN_CH, HID, OUT_CH, NUM_EDGES = 32, 8, 32, 16, 96  # 96 % 48 == 0

    key = jax.random.PRNGKey(0)
    kx, ke, ka, kp = jax.random.split(key, 4)
    x = jax.random.normal(kx, (NUM_NODES, IN_CH), jnp.float32)
    edge_index = jax.random.randint(ke, (2, NUM_EDGES), 0, NUM_NODES, dtype=jnp.int32)
    edge_attr = jax.random.normal(ka, (NUM_EDGES, 1), jnp.float32)
    params = make_params(kp, IN_CH, HID, OUT_CH)

    out = sage_edge2_pallas(x, edge_index, edge_attr, params, NUM_NODES)
    out = jax.block_until_ready(out)

    ref = sage_edge2_ref(x, edge_index, edge_attr, params, NUM_NODES)
    assert out.shape == (NUM_EDGES, 1)
    assert jnp.allclose(out, ref, atol=1e-4, rtol=1e-4), float(jnp.max(jnp.abs(out - ref)))
    print("KERNEL_OK")
</pallas_src>

<mosaic_0001>
module attributes {stable_mosaic.version = 11 : i64} {
  func.func @sage_edge2_kernel(%arg0: memref<32x8xf32, #tpu.memory_space<vmem>>, %arg1: memref<96x1xf32, #tpu.memory_space<vmem>>, %arg2: memref<96x32xf32, #tpu.memory_space<vmem>>, %arg3: memref<96x32xf32, #tpu.memory_space<vmem>>, %arg4: memref<32x96xf32, #tpu.memory_space<vmem>>, %arg5: memref<8x32xf32, #tpu.memory_space<vmem>>, %arg6: memref<1x32xf32, #tpu.memory_space<vmem>>, %arg7: memref<1x32xf32, #tpu.memory_space<vmem>>, %arg8: memref<1x32xf32, #tpu.memory_space<vmem>>, %arg9: memref<32x32xf32, #tpu.memory_space<vmem>>, %arg10: memref<1x32xf32, #tpu.memory_space<vmem>>, %arg11: memref<32x32xf32, #tpu.memory_space<vmem>>, %arg12: memref<32x32xf32, #tpu.memory_space<vmem>>, %arg13: memref<1x32xf32, #tpu.memory_space<vmem>>, %arg14: memref<1x32xf32, #tpu.memory_space<vmem>>, %arg15: memref<1x32xf32, #tpu.memory_space<vmem>>, %arg16: memref<32x32xf32, #tpu.memory_space<vmem>>, %arg17: memref<1x32xf32, #tpu.memory_space<vmem>>, %arg18: memref<32x32xf32, #tpu.memory_space<vmem>>, %arg19: memref<32x32xf32, #tpu.memory_space<vmem>>, %arg20: memref<1x32xf32, #tpu.memory_space<vmem>>, %arg21: memref<1x32xf32, #tpu.memory_space<vmem>>, %arg22: memref<1x32xf32, #tpu.memory_space<vmem>>, %arg23: memref<32x16xf32, #tpu.memory_space<vmem>>, %arg24: memref<1x16xf32, #tpu.memory_space<vmem>>, %arg25: memref<32x16xf32, #tpu.memory_space<vmem>>, %arg26: memref<16x16xf32, #tpu.memory_space<vmem>>, %arg27: memref<1x16xf32, #tpu.memory_space<vmem>>, %arg28: memref<16x32xf32, #tpu.memory_space<vmem>>, %arg29: memref<1x32xf32, #tpu.memory_space<vmem>>, %arg30: memref<1x32xf32, #tpu.memory_space<vmem>>, %arg31: memref<1x32xf32, #tpu.memory_space<vmem>>, %arg32: memref<1x32xf32, #tpu.memory_space<vmem>>, %arg33: memref<1x32xf32, #tpu.memory_space<vmem>>, %arg34: memref<1x1xf32, #tpu.memory_space<vmem>>, %arg35: memref<96x1xf32, #tpu.memory_space<vmem>>) attributes {dimension_semantics = [], scalar_prefetch = 0 : i64, scratch_operands = 0 : i64, tpu.core_type = #tpu.core_type<tc>} {
    %c0 = arith.constant 0 : index
    %c0_0 = arith.constant 0 : index
    %0 = vector.load %arg0[%c0, %c0_0] : memref<32x8xf32, #tpu.memory_space<vmem>>, vector<32x8xf32>
    %c0_1 = arith.constant 0 : index
    %c0_2 = arith.constant 0 : index
    %1 = vector.load %arg1[%c0_1, %c0_2] : memref<96x1xf32, #tpu.memory_space<vmem>>, vector<96x1xf32>
    %c0_3 = arith.constant 0 : index
    %c0_4 = arith.constant 0 : index
    %2 = vector.load %arg2[%c0_3, %c0_4] : memref<96x32xf32, #tpu.memory_space<vmem>>, vector<96x32xf32>
    %c0_5 = arith.constant 0 : index
    %c0_6 = arith.constant 0 : index
    %3 = vector.load %arg3[%c0_5, %c0_6] : memref<96x32xf32, #tpu.memory_space<vmem>>, vector<96x32xf32>
    %c0_7 = arith.constant 0 : index
    %c0_8 = arith.constant 0 : index
    %4 = vector.load %arg4[%c0_7, %c0_8] : memref<32x96xf32, #tpu.memory_space<vmem>>, vector<32x96xf32>
    %c0_9 = arith.constant 0 : index
    %c0_10 = arith.constant 0 : index
    %5 = vector.load %arg5[%c0_9, %c0_10] : memref<8x32xf32, #tpu.memory_space<vmem>>, vector<8x32xf32>
    %cst = arith.constant dense<0.000000e+00> : vector<32x32xf32>
    %6 = tpu.matmul %0, %5, %cst {dimension_numbers = #tpu.dot_dimension_numbers<[1], [0], [0], [1], [0, 0, 1, 1], [], []>} : vector<32x8xf32>, vector<8x32xf32>, vector<32x32xf32> -> vector<32x32xf32>
    %c0_11 = arith.constant 0 : index
    %c0_12 = arith.constant 0 : index
    %7 = vector.load %arg6[%c0_11, %c0_12] : memref<1x32xf32, #tpu.memory_space<vmem>>, vector<1x32xf32>
    %8 = vector.broadcast %7 : vector<1x32xf32> to vector<32x32xf32>
    %9 = arith.addf %6, %8 : vector<32x32xf32>
    %cst_13 = arith.constant 0.000000e+00 : f32
    %10 = vector.broadcast %cst_13 : f32 to vector<32x32xf32>
    %11 = arith.maximumf %9, %10 : vector<32x32xf32>
    %c0_14 = arith.constant 0 : index
    %c0_15 = arith.constant 0 : index
    %12 = vector.load %arg7[%c0_14, %c0_15] : memref<1x32xf32, #tpu.memory_space<vmem>>, vector<1x32xf32>
    %13 = vector.broadcast %1 : vector<96x1xf32> to vector<96x32xf32>
    %14 = vector.broadcast %12 : vector<1x32xf32> to vector<96x32xf32>
    %15 = arith.mulf %13, %14 : vector<96x32xf32>
    %c0_16 = arith.constant 0 : index
    %c0_17 = arith.constant 0 : index
    %16 = vector.load %arg8[%c0_16, %c0_17] : memref<1x32xf32, #tpu.memory_space<vmem>>, vector<1x32xf32>
    %17 = vector.broadcast %16 : vector<1x32xf32> to vector<96x32xf32>
    %18 = arith.addf %15, %17 : vector<96x32xf32>
    %cst_18 = arith.constant dense<0.000000e+00> : vector<96x32xf32>
    %19 = tpu.matmul %2, %11, %cst_18 {dimension_numbers = #tpu.dot_dimension_numbers<[1], [0], [0], [1], [0, 0, 1, 1], [], []>} : vector<96x32xf32>, vector<32x32xf32>, vector<96x32xf32> -> vector<96x32xf32>
    %20 = arith.addf %19, %18 : vector<96x32xf32>
    %cst_19 = arith.constant 0.000000e+00 : f32
    %21 = vector.broadcast %cst_19 : f32 to vector<96x32xf32>
    %22 = arith.maximumf %20, %21 : vector<96x32xf32>
    %cst_20 = arith.constant dense<0.000000e+00> : vector<32x32xf32>
    %23 = tpu.matmul %4, %22, %cst_20 {dimension_numbers = #tpu.dot_dimension_numbers<[1], [0], [0], [1], [0, 0, 1, 1], [], []>} : vector<32x96xf32>, vector<96x32xf32>, vector<32x32xf32> -> vector<32x32xf32>
    %c0_21 = arith.constant 0 : index
    %c0_22 = arith.constant 0 : index
    %24 = vector.load %arg9[%c0_21, %c0_22] : memref<32x32xf32, #tpu.memory_space<vmem>>, vector<32x32xf32>
    %cst_23 = arith.constant dense<0.000000e+00> : vector<32x32xf32>
    %25 = tpu.matmul %23, %24, %cst_23 {dimension_numbers = #tpu.dot_dimension_numbers<[1], [0], [0], [1], [0, 0, 1, 1], [], []>} : vector<32x32xf32>, vector<32x32xf32>, vector<32x32xf32> -> vector<32x32xf32>
    %c0_24 = arith.constant 0 : index
    %c0_25 = arith.constant 0 : index
    %26 = vector.load %arg10[%c0_24, %c0_25] : memref<1x32xf32, #tpu.memory_space<vmem>>, vector<1x32xf32>
    %27 = vector.broadcast %26 : vector<1x32xf32> to vector<32x32xf32>
    %28 = arith.addf %25, %27 : vector<32x32xf32>
    %c0_26 = arith.constant 0 : index
    %c0_27 = arith.constant 0 : index
    %29 = vector.load %arg11[%c0_26, %c0_27] : memref<32x32xf32, #tpu.memory_space<vmem>>, vector<32x32xf32>
    %cst_28 = arith.constant dense<0.000000e+00> : vector<32x32xf32>
    %30 = tpu.matmul %11, %29, %cst_28 {dimension_numbers = #tpu.dot_dimension_numbers<[1], [0], [0], [1], [0, 0, 1, 1], [], []>} : vector<32x32xf32>, vector<32x32xf32>, vector<32x32xf32> -> vector<32x32xf32>
    %31 = arith.addf %28, %30 : vector<32x32xf32>
    %cst_29 = arith.constant 0.000000e+00 : f32
    %32 = vector.broadcast %cst_29 : f32 to vector<32x32xf32>
    %33 = arith.maximumf %31, %32 : vector<32x32xf32>
    %c0_30 = arith.constant 0 : index
    %c0_31 = arith.constant 0 : index
    %34 = vector.load %arg12[%c0_30, %c0_31] : memref<32x32xf32, #tpu.memory_space<vmem>>, vector<32x32xf32>
    %cst_32 = arith.constant dense<0.000000e+00> : vector<32x32xf32>
    %35 = tpu.matmul %33, %34, %cst_32 {dimension_numbers = #tpu.dot_dimension_numbers<[1], [0], [0], [1], [0, 0, 1, 1], [], []>} : vector<32x32xf32>, vector<32x32xf32>, vector<32x32xf32> -> vector<32x32xf32>
    %c0_33 = arith.constant 0 : index
    %c0_34 = arith.constant 0 : index
    %36 = vector.load %arg13[%c0_33, %c0_34] : memref<1x32xf32, #tpu.memory_space<vmem>>, vector<1x32xf32>
    %37 = vector.broadcast %36 : vector<1x32xf32> to vector<32x32xf32>
    %38 = arith.addf %35, %37 : vector<32x32xf32>
    %cst_35 = arith.constant 0.00999999977 : f32
    %39 = vector.broadcast %cst_35 : f32 to vector<32x32xf32>
    %40 = arith.mulf %39, %38 : vector<32x32xf32>
    %41 = arith.maximumf %38, %40 : vector<32x32xf32>
    %c0_36 = arith.constant 0 : index
    %c0_37 = arith.constant 0 : index
    %42 = vector.load %arg14[%c0_36, %c0_37] : memref<1x32xf32, #tpu.memory_space<vmem>>, vector<1x32xf32>
    %43 = vector.broadcast %1 : vector<96x1xf32> to vector<96x32xf32>
    %44 = vector.broadcast %42 : vector<1x32xf32> to vector<96x32xf32>
    %45 = arith.mulf %43, %44 : vector<96x32xf32>
    %c0_38 = arith.constant 0 : index
    %c0_39 = arith.constant 0 : index
    %46 = vector.load %arg15[%c0_38, %c0_39] : memref<1x32xf32, #tpu.memory_space<vmem>>, vector<1x32xf32>
    %47 = vector.broadcast %46 : vector<1x32xf32> to vector<96x32xf32>
    %48 = arith.addf %45, %47 : vector<96x32xf32>
    %cst_40 = arith.constant dense<0.000000e+00> : vector<96x32xf32>
    %49 = tpu.matmul %2, %41, %cst_40 {dimension_numbers = #tpu.dot_dimension_numbers<[1], [0], [0], [1], [0, 0, 1, 1], [], []>} : vector<96x32xf32>, vector<32x32xf32>, vector<96x32xf32> -> vector<96x32xf32>
    %50 = arith.addf %49, %48 : vector<96x32xf32>
    %cst_41 = arith.constant 0.000000e+00 : f32
    %51 = vector.broadcast %cst_41 : f32 to vector<96x32xf32>
    %52 = arith.maximumf %50, %51 : vector<96x32xf32>
    %cst_42 = arith.constant dense<0.000000e+00> : vector<32x32xf32>
    %53 = tpu.matmul %4, %52, %cst_42 {dimension_numbers = #tpu.dot_dimension_numbers<[1], [0], [0], [1], [0, 0, 1, 1], [], []>} : vector<32x96xf32>, vector<96x32xf32>, vector<32x32xf32> -> vector<32x32xf32>
    %c0_43 = arith.constant 0 : index
    %c0_44 = arith.constant 0 : index
    %54 = vector.load %arg16[%c0_43, %c0_44] : memref<32x32xf32, #tpu.memory_space<vmem>>, vector<32x32xf32>
    %cst_45 = arith.constant dense<0.000000e+00> : vector<32x32xf32>
    %55 = tpu.matmul %53, %54, %cst_45 {dimension_numbers = #tpu.dot_dimension_numbers<[1], [0], [0], [1], [0, 0, 1, 1], [], []>} : vector<32x32xf32>, vector<32x32xf32>, vector<32x32xf32> -> vector<32x32xf32>
    %c0_46 = arith.constant 0 : index
    %c0_47 = arith.constant 0 : index
    %56 = vector.load %arg17[%c0_46, %c0_47] : memref<1x32xf32, #tpu.memory_space<vmem>>, vector<1x32xf32>
    %57 = vector.broadcast %56 : vector<1x32xf32> to vector<32x32xf32>
    %58 = arith.addf %55, %57 : vector<32x32xf32>
    %c0_48 = arith.constant 0 : index
    %c0_49 = arith.constant 0 : index
    %59 = vector.load %arg18[%c0_48, %c0_49] : memref<32x32xf32, #tpu.memory_space<vmem>>, vector<32x32xf32>
    %cst_50 = arith.constant dense<0.000000e+00> : vector<32x32xf32>
    %60 = tpu.matmul %41, %59, %cst_50 {dimension_numbers = #tpu.dot_dimension_numbers<[1], [0], [0], [1], [0, 0, 1, 1], [], []>} : vector<32x32xf32>, vector<32x32xf32>, vector<32x32xf32> -> vector<32x32xf32>
    %61 = arith.addf %58, %60 : vector<32x32xf32>
    %cst_51 = arith.constant 0.000000e+00 : f32
    %62 = vector.broadcast %cst_51 : f32 to vector<32x32xf32>
    %63 = arith.maximumf %61, %62 : vector<32x32xf32>
    %c0_52 = arith.constant 0 : index
    %c0_53 = arith.constant 0 : index
    %64 = vector.load %arg19[%c0_52, %c0_53] : memref<32x32xf32, #tpu.memory_space<vmem>>, vector<32x32xf32>
    %cst_54 = arith.constant dense<0.000000e+00> : vector<32x32xf32>
    %65 = tpu.matmul %63, %64, %cst_54 {dimension_numbers = #tpu.dot_dimension_numbers<[1], [0], [0], [1], [0, 0, 1, 1], [], []>} : vector<32x32xf32>, vector<32x32xf32>, vector<32x32xf32> -> vector<32x32xf32>
    %c0_55 = arith.constant 0 : index
    %c0_56 = arith.constant 0 : index
    %66 = vector.load %arg20[%c0_55, %c0_56] : memref<1x32xf32, #tpu.memory_space<vmem>>, vector<1x32xf32>
    %67 = vector.broadcast %66 : vector<1x32xf32> to vector<32x32xf32>
    %68 = arith.addf %65, %67 : vector<32x32xf32>
    %cst_57 = arith.constant 0.00999999977 : f32
    %69 = vector.broadcast %cst_57 : f32 to vector<32x32xf32>
    %70 = arith.mulf %69, %68 : vector<32x32xf32>
    %71 = arith.maximumf %68, %70 : vector<32x32xf32>
    %c0_58 = arith.constant 0 : index
    %c0_59 = arith.constant 0 : index
    %72 = vector.load %arg21[%c0_58, %c0_59] : memref<1x32xf32, #tpu.memory_space<vmem>>, vector<1x32xf32>
    %73 = vector.broadcast %1 : vector<96x1xf32> to vector<96x32xf32>
    %74 = vector.broadcast %72 : vector<1x32xf32> to vector<96x32xf32>
    %75 = arith.mulf %73, %74 : vector<96x32xf32>
    %c0_60 = arith.constant 0 : index
    %c0_61 = arith.constant 0 : index
    %76 = vector.load %arg22[%c0_60, %c0_61] : memref<1x32xf32, #tpu.memory_space<vmem>>, vector<1x32xf32>
    %77 = vector.broadcast %76 : vector<1x32xf32> to vector<96x32xf32>
    %78 = arith.addf %75, %77 : vector<96x32xf32>
    %cst_62 = arith.constant dense<0.000000e+00> : vector<96x32xf32>
    %79 = tpu.matmul %2, %71, %cst_62 {dimension_numbers = #tpu.dot_dimension_numbers<[1], [0], [0], [1], [0, 0, 1, 1], [], []>} : vector<96x32xf32>, vector<32x32xf32>, vector<96x32xf32> -> vector<96x32xf32>
    %80 = arith.addf %79, %78 : vector<96x32xf32>
    %cst_63 = arith.constant 0.000000e+00 : f32
    %81 = vector.broadcast %cst_63 : f32 to vector<96x32xf32>
    %82 = arith.maximumf %80, %81 : vector<96x32xf32>
    %cst_64 = arith.constant dense<0.000000e+00> : vector<32x32xf32>
    %83 = tpu.matmul %4, %82, %cst_64 {dimension_numbers = #tpu.dot_dimension_numbers<[1], [0], [0], [1], [0, 0, 1, 1], [], []>} : vector<32x96xf32>, vector<96x32xf32>, vector<32x32xf32> -> vector<32x32xf32>
    %c0_65 = arith.constant 0 : index
    %c0_66 = arith.constant 0 : index
    %84 = vector.load %arg23[%c0_65, %c0_66] : memref<32x16xf32, #tpu.memory_space<vmem>>, vector<32x16xf32>
    %cst_67 = arith.constant dense<0.000000e+00> : vector<32x16xf32>
    %85 = tpu.matmul %83, %84, %cst_67 {dimension_numbers = #tpu.dot_dimension_numbers<[1], [0], [0], [1], [0, 0, 1, 1], [], []>} : vector<32x32xf32>, vector<32x16xf32>, vector<32x16xf32> -> vector<32x16xf32>
    %c0_68 = arith.constant 0 : index
    %c0_69 = arith.constant 0 : index
    %86 = vector.load %arg24[%c0_68, %c0_69] : memref<1x16xf32, #tpu.memory_space<vmem>>, vector<1x16xf32>
    %87 = vector.broadcast %86 : vector<1x16xf32> to vector<32x16xf32>
    %88 = arith.addf %85, %87 : vector<32x16xf32>
    %c0_70 = arith.constant 0 : index
    %c0_71 = arith.constant 0 : index
    %89 = vector.load %arg25[%c0_70, %c0_71] : memref<32x16xf32, #tpu.memory_space<vmem>>, vector<32x16xf32>
    %cst_72 = arith.constant dense<0.000000e+00> : vector<32x16xf32>
    %90 = tpu.matmul %71, %89, %cst_72 {dimension_numbers = #tpu.dot_dimension_numbers<[1], [0], [0], [1], [0, 0, 1, 1], [], []>} : vector<32x32xf32>, vector<32x16xf32>, vector<32x16xf32> -> vector<32x16xf32>
    %91 = arith.addf %88, %90 : vector<32x16xf32>
    %cst_73 = arith.constant 0.000000e+00 : f32
    %92 = vector.broadcast %cst_73 : f32 to vector<32x16xf32>
    %93 = arith.maximumf %91, %92 : vector<32x16xf32>
    %c0_74 = arith.constant 0 : index
    %c0_75 = arith.constant 0 : index
    %94 = vector.load %arg26[%c0_74, %c0_75] : memref<16x16xf32, #tpu.memory_space<vmem>>, vector<16x16xf32>
    %cst_76 = arith.constant dense<0.000000e+00> : vector<32x16xf32>
    %95 = tpu.matmul %93, %94, %cst_76 {dimension_numbers = #tpu.dot_dimension_numbers<[1], [0], [0], [1], [0, 0, 1, 1], [], []>} : vector<32x16xf32>, vector<16x16xf32>, vector<32x16xf32> -> vector<32x16xf32>
    %c0_77 = arith.constant 0 : index
    %c0_78 = arith.constant 0 : index
    %96 = vector.load %arg27[%c0_77, %c0_78] : memref<1x16xf32, #tpu.memory_space<vmem>>, vector<1x16xf32>
    %97 = vector.broadcast %96 : vector<1x16xf32> to vector<32x16xf32>
    %98 = arith.addf %95, %97 : vector<32x16xf32>
    %cst_79 = arith.constant 0.00999999977 : f32
    %99 = vector.broadcast %cst_79 : f32 to vector<32x16xf32>
    %100 = arith.mulf %99, %98 : vector<32x16xf32>
    %101 = arith.maximumf %98, %100 : vector<32x16xf32>
    %c0_80 = arith.constant 0 : index
    %c0_81 = arith.constant 0 : index
    %102 = vector.load %arg28[%c0_80, %c0_81] : memref<16x32xf32, #tpu.memory_space<vmem>>, vector<16x32xf32>
    %cst_82 = arith.constant dense<0.000000e+00> : vector<32x32xf32>
    %103 = tpu.matmul %101, %102, %cst_82 {dimension_numbers = #tpu.dot_dimension_numbers<[1], [0], [0], [1], [0, 0, 1, 1], [], []>} : vector<32x16xf32>, vector<16x32xf32>, vector<32x32xf32> -> vector<32x32xf32>
    %c0_83 = arith.constant 0 : index
    %c0_84 = arith.constant 0 : index
    %104 = vector.load %arg29[%c0_83, %c0_84] : memref<1x32xf32, #tpu.memory_space<vmem>>, vector<1x32xf32>
    %105 = vector.broadcast %104 : vector<1x32xf32> to vector<32x32xf32>
    %106 = arith.addf %103, %105 : vector<32x32xf32>
    %c0_85 = arith.constant 0 : index
    %c0_86 = arith.constant 0 : index
    %107 = vector.load %arg30[%c0_85, %c0_86] : memref<1x32xf32, #tpu.memory_space<vmem>>, vector<1x32xf32>
    %108 = vector.broadcast %107 : vector<1x32xf32> to vector<32x32xf32>
    %109 = arith.mulf %106, %108 : vector<32x32xf32>
    %c0_87 = arith.constant 0 : index
    %c0_88 = arith.constant 0 : index
    %110 = vector.load %arg31[%c0_87, %c0_88] : memref<1x32xf32, #tpu.memory_space<vmem>>, vector<1x32xf32>
    %111 = vector.broadcast %110 : vector<1x32xf32> to vector<32x32xf32>
    %112 = arith.addf %109, %111 : vector<32x32xf32>
    %cst_89 = arith.constant 0.00999999977 : f32
    %113 = vector.broadcast %cst_89 : f32 to vector<32x32xf32>
    %114 = arith.mulf %113, %112 : vector<32x32xf32>
    %115 = arith.maximumf %112, %114 : vector<32x32xf32>
    %cst_90 = arith.constant dense<0.000000e+00> : vector<96x32xf32>
    %116 = tpu.matmul %2, %115, %cst_90 {dimension_numbers = #tpu.dot_dimension_numbers<[1], [0], [0], [1], [0, 0, 1, 1], [], []>} : vector<96x32xf32>, vector<32x32xf32>, vector<96x32xf32> -> vector<96x32xf32>
    %cst_91 = arith.constant dense<0.000000e+00> : vector<96x32xf32>
    %117 = tpu.matmul %3, %115, %cst_91 {dimension_numbers = #tpu.dot_dimension_numbers<[1], [0], [0], [1], [0, 0, 1, 1], [], []>} : vector<96x32xf32>, vector<32x32xf32>, vector<96x32xf32> -> vector<96x32xf32>
    %c0_92 = arith.constant 0 : index
    %c0_93 = arith.constant 0 : index
    %118 = vector.load %arg32[%c0_92, %c0_93] : memref<1x32xf32, #tpu.memory_space<vmem>>, vector<1x32xf32>
    %119 = vector.broadcast %118 : vector<1x32xf32> to vector<96x32xf32>
    %120 = arith.mulf %116, %119 : vector<96x32xf32>
    %cst_94 = arith.constant dense<0.000000e+00> : vector<96xf32>
    %121 = vector.multi_reduction <add>, %120, %cst_94 [1] : vector<96x32xf32> to vector<96xf32>
    %122 = vector.shape_cast %121 : vector<96xf32> to vector<96x1xf32>
    %c0_95 = arith.constant 0 : index
    %c0_96 = arith.constant 0 : index
    %123 = vector.load %arg33[%c0_95, %c0_96] : memref<1x32xf32, #tpu.memory_space<vmem>>, vector<1x32xf32>
    %124 = vector.broadcast %123 : vector<1x32xf32> to vector<96x32xf32>
    %125 = arith.mulf %117, %124 : vector<96x32xf32>
    %cst_97 = arith.constant dense<0.000000e+00> : vector<96xf32>
    %126 = vector.multi_reduction <add>, %125, %cst_97 [1] : vector<96x32xf32> to vector<96xf32>
    %127 = vector.shape_cast %126 : vector<96xf32> to vector<96x1xf32>
    %128 = arith.addf %122, %127 : vector<96x1xf32>
    %c0_98 = arith.constant 0 : index
    %c0_99 = arith.constant 0 : index
    %129 = vector.load %arg34[%c0_98, %c0_99] : memref<1x1xf32, #tpu.memory_space<vmem>>, vector<1x1xf32>
    %130 = vector.broadcast %129 : vector<1x1xf32> to vector<96x1xf32>
    %131 = arith.addf %128, %130 : vector<96x1xf32>
    %cst_100 = arith.constant 0.000000e+00 : f32
    %132 = vector.broadcast %cst_100 : f32 to vector<96x1xf32>
    %133 = arith.subf %132, %131 : vector<96x1xf32>
    %134 = math.exp %133 : vector<96x1xf32>
    %cst_101 = arith.constant 1.000000e+00 : f32
    %135 = vector.broadcast %cst_101 : f32 to vector<96x1xf32>
    %136 = arith.addf %135, %134 : vector<96x1xf32>
    %cst_102 = arith.constant 1.000000e+00 : f32
    %137 = vector.broadcast %cst_102 : f32 to vector<96x1xf32>
    %138 = arith.divf %137, %136 : vector<96x1xf32>
    %c0_103 = arith.constant 0 : index
    %c0_104 = arith.constant 0 : index
    %139 = vector.load %arg35[%c0_103, %c0_104] : memref<96x1xf32, #tpu.memory_space<vmem>>, vector<96x1xf32>
    tpu.vector_store %arg35[%c0_103, %c0_104], %138 {strides = array<i32>} : memref<96x1xf32, #tpu.memory_space<vmem>>, vector<96x1xf32>,
    return
  }
}

</mosaic_0001>

<bundles_post_ra>
// kernel: tpu_custom_call.1
= control target key start
LH: loop header
LB: loop body
LE: loop exit
PB: predicated region body
PF: predicated region fallthrough
CT: control target
= control target key end

     0   :  { %s3887_s3 = smov 5   ;;  %vm200_vm0 = vcmask 64512   ;;  %s3888_s10 = smov 2   ;;  %vm400_vm1 = vcmask 261120   ;;  %v3889_v6 = vmov 0   ;;  %vm574_vm2 = vcmask 785408   ;;  %s4528_s0 = inlined_call_operand.smem [shape: u32[36], index: -1, kind: input, shape index: {}] }
   0x1   :  { %s2846_s6 = sld [smem:[%s4528_s0 + %s3887_s3]]   ;;  %3825 = vset.pattern.permute.xlu0 %v3889_v6  ;;  %s3890_s14 = smov 1   ;;  %3826 = vset.pattern.permute.xlu1 %v3889_v6  ;;  %vm2084_vm3 = vcmask 130048   ;;  %vm2825_vm4 = vcmask 7168  }
   0x2   :  { %s1_s9 = sld [smem:[%s4528_s0]]   ;;  %s3891_s18 = smov 6  }
   0x3   :  { %s3937_s13 = sld [smem:[%s4528_s0 + %s3888_s10]]   ;;  %s3892_s22 = smov 4  }
   0x4   :  { %s2842_s17 = sld [smem:[%s4528_s0 + %s3890_s14]]   ;;  %s3893_s26 = smov 9  }
   0x5   :  { %s2847_s21 = sld [smem:[%s4528_s0 + %s3891_s18]]   ;;  %s3894_s30 = smov 7  }
   0x6   :  { %s4028_s25 = sld [smem:[%s4528_s0 + %s3892_s22]]   ;;  %s3895_s4 = smov 8  }
   0x7   :  { %v192_v0 = vld [vmem:[%s2846_s6] sm:$0xff]  ;;  %s2850_s29 = sld [smem:[%s4528_s0 + %s3893_s26]]   ;;  %s3896_s8 = smov 11  }
   0x8   :  { %v148_v1 = vld [vmem:[%s1_s9] sm:$0xff]  ;;  %v149_v2 = vld [vmem:[%s1_s9 + $0x8] sm:$0xff]  ;;  %3221 = vmatprep.subr.mxu0 %v192_v0  ;;  %v150_v3 = vld [vmem:[%s1_s9 + $0x10] sm:$0xff]  ;;  %s2848_s3 = sld [smem:[%s4528_s0 + %s3894_s30]]   ;;  %s3897_s12 = smov 12  }
   0x9   :  { %3223 = vmatprep.mubr.msk.f32.mxu0 %vm200_vm0, %v148_v1  ;;  %3222 = vmatpush3.msra.mxu0 %v192_v0  ;;  %v151_v4 = vld [vmem:[%s1_s9 + $0x18] sm:$0xff]  ;;  %v3940_v5 = vld [vmem:[%s3937_s13] sm:$0xff]  ;;  %v3971_v34 = vld [vmem:[%s3937_s13 + $0x8] sm:$0xff]  ;;  %s2849_s7 = sld [smem:[%s4528_s0 + %s3895_s4]]  }
   0xa   :  { %3224 = vmatmul.mubr.msk.f32.vlgmr.msra.gmra.mrb[0].mxu0 %vm200_vm0, %v149_v2  ;;  %3237 = vmatprep.mubr.msk.f32.mxu1 %vm400_vm1, %v3940_v5  ;;  %v152_v7 = vld [vmem:[%s2842_s17] sm:$0xff]  ;;  %v154_v8 = vld [vmem:[%s2842_s17 + $0x10] sm:$0xff]  ;;  %v153_v9 = vld [vmem:[%s2842_s17 + $0x8] sm:$0xff]  ;;  %s2852_s11 = sld [smem:[%s4528_s0 + %s3896_s8]]  }
   0xb   :  { %3226 = vmatprep.mubr.msk.f32.mxu0 %vm200_vm0, %v150_v3  ;;  %305 = vperm.xlu0 %3825, %v152_v7   ;;  %v155_v10 = vld [vmem:[%s2842_s17 + $0x18] sm:$0xff]  ;;  %v156_v11 = vld [vmem:[%s2842_s17 + $0x20] sm:$0xff]  ;;  %v157_v12 = vld [vmem:[%s2842_s17 + $0x28] sm:$0xff]  ;;  %s2853_s16 = sld [smem:[%s4528_s0 + %s3897_s12]]  }
   0xc   :  { %315 = vperm.xlu1 %3826, %v154_v8   ;;  %v158_v13 = vld [vmem:[%s2842_s17 + $0x30] sm:$0xff]  ;;  %v159_v14 = vld [vmem:[%s2842_s17 + $0x38] sm:$0xff]  ;;  %v160_v15 = vld [vmem:[%s2842_s17 + $0x40] sm:$0xff] }
   0xd   :  { %v161_v16 = vld [vmem:[%s2842_s17 + $0x48] sm:$0xff]  ;;  %v162_v17 = vld [vmem:[%s2842_s17 + $0x50] sm:$0xff]  ;;  %v163_v18 = vld [vmem:[%s2842_s17 + $0x58] sm:$0xff]  ;;  %s3898_s17 = smov 10  }
   0xe   :  { %3227 = vmatmul.mubr.msk.f32.gmra.mrb[2].mxu0 %vm200_vm0, %v151_v4  ;;  %v2877_v19 = vld [vmem:[%s2847_s21] ss:$0 sm:$0xff]  ;;  %v3974_v35 = vld [vmem:[%s3937_s13 + $0x10] sm:$0xff]  ;;  %v3981_v36 = vld [vmem:[%s3937_s13 + $0x18] sm:$0xff]  ;;  %s2851_s20 = sld [smem:[%s4528_s0 + %s3898_s17]]   ;;  %s3899_s21 = smov 13  }
   0xf   :  { %310 = vperm.xlu0 %3825, %v153_v9   ;;  %v3984_v37 = vld [vmem:[%s3937_s13 + $0x20] sm:$0xff]  ;;  %v3991_v38 = vld [vmem:[%s3937_s13 + $0x28] sm:$0xff]  ;;  %v3994_v39 = vld [vmem:[%s3937_s13 + $0x30] sm:$0xff]  ;;  %s2854_s24 = sld [smem:[%s4528_s0 + %s3899_s21]]  }
  0x10   :  { %320 = vperm.xlu1 %3826, %v155_v10   ;;  %v4001_v40 = vld [vmem:[%s3937_s13 + $0x38] sm:$0xff]  ;;  %v4004_v41 = vld [vmem:[%s3937_s13 + $0x40] sm:$0xff]  ;;  %v4011_v42 = vld [vmem:[%s3937_s13 + $0x48] sm:$0xff] }
  0x11   :  { %v4014_v43 = vld [vmem:[%s3937_s13 + $0x50] sm:$0xff]  ;;  %v4021_v44 = vld [vmem:[%s3937_s13 + $0x58] sm:$0xff]  ;;  %v4031_v45 = vld [vmem:[%s4028_s25] sm:$0xff] }
  0x12   :  { %3279 = vmatprep.mubr.msk.f32.mxu0 %vm574_vm2, %v4031_v45  ;;  %v672_v46 = vld [vmem:[%s2850_s29] sm:$0xff]  ;;  %v673_v47 = vld [vmem:[%s2850_s29 + $0x8] sm:$0xff]  ;;  %v674_v48 = vld [vmem:[%s2850_s29 + $0x10] sm:$0xff] }
  0x13   :  { %325 = vperm.xlu0 %3825, %v156_v11   ;;  %v3613_v49 = vpack.c.bf16 %v673_v47, %v672_v46  ;;  %v675_v50 = vld [vmem:[%s2850_s29 + $0x18] sm:$0xff]  ;;  %v2882_v56 = vld [vmem:[%s2848_s3] ss:$0 sm:$0xff]  ;;  %s3901_s29 = smov 14   ;;  %s3902_s3 = smov 15  }
  0x14   :  { %330 = vperm.xlu1 %3826, %v157_v12   ;;  %v3617_v51 = vpack.c.bf16 %v675_v50, %v674_v48  ;;  %v4058_v61 = vld [vmem:[%s2849_s7] ss:$0 sm:$0xff]  ;;  %s2855_s2 = sld [smem:[%s4528_s0 + %s3901_s29]]   ;;  %s3903_s7 = smov 18  }
  0x15   :  { %s2856_s6 = sld [smem:[%s4528_s0 + %s3902_s3]]  }
  0x16   :  { %s2859_s10 = sld [smem:[%s4528_s0 + %s3903_s7]]  }
  0x17   :  { %335 = vperm.xlu0 %3825, %v158_v13  }
  0x18   :  { %340 = vperm.xlu1 %3826, %v159_v14  }
  0x1b   :  { %345 = vperm.xlu0 %3825, %v160_v15  }
  0x1c   :  { %350 = vperm.xlu1 %3826, %v161_v16  }
  0x1f   :  { %355 = vperm.xlu0 %3825, %v162_v17  }
  0x20   :  { %360 = vperm.xlu1 %3826, %v163_v18  }
  0x8a   :  { %v4040_v53 = vpop.permute.xlu0 %305 }
  0x8b   :  { %v4038_v52 = vpop.permute.xlu1 %315  ;;  %v369_v60 = vmul.f32 %v2882_v56, %v4040_v53 }
  0x8c   :  { %v371_v0 = vmul.f32 %v2882_v56, %v4038_v52 }
  0x8d   :  { %v388_v3 = vadd.f32 %v4058_v61, %v369_v60 }
  0x8e   :  { %v4050_v55 = vpop.permute.xlu0 %310  ;;  %v390_v15 = vadd.f32 %v4058_v61, %v371_v0 }
  0x8f   :  { %v4045_v54 = vpop.permute.xlu1 %320  ;;  %v370_v58 = vmul.f32 %v2882_v56, %v4050_v55 }
  0x90   :  { %v372_v62 = vmul.f32 %v2882_v56, %v4045_v54 }
  0x91   :  { %v389_v63 = vadd.f32 %v4058_v61, %v370_v58 }
  0x92   :  { %v4055_v59 = vpop.permute.xlu0 %325  ;;  %v391_v11 = vadd.f32 %v4058_v61, %v372_v62 }
  0x93   :  { %v4052_v57 = vpop.permute.xlu1 %330  ;;  %v373_v12 = vmul.f32 %v2882_v56, %v4055_v59 }
  0x94   :  { %v374_v9 = vmul.f32 %v2882_v56, %v4052_v57 }
  0x95   :  { %v392_v48 = vadd.f32 %v4058_v61, %v373_v12 }
  0x96   :  { %v4066_v4 = vpop.permute.xlu0 %335 }
  0x97   :  { %v4063_v1 = vpop.permute.xlu1 %340 }
  0x9b   :  { %v4072_v18 = vpop.permute.xlu1 %350 }
  0x9c   :  { %v378_v60 = vmul.f32 %v2882_v56, %v4072_v18 }
  0xdd   :  { %v3225_v20 = vpop.f32.mrb[0].mxu0 }
  0xde   :  { %v3950_v21 = vadd.f32 %v3225_v20, %v2877_v19  ;;  %v279_v22 = vpop.f32.mrb[1].mxu0 }
  0xdf   :  { %v3952_v23 = vadd.f32 %v2877_v19, %v279_v22  ;;  %v376_v22 = vmul.f32 %v2882_v56, %v4063_v1 }
  0xe0   :  { %v299_v24 = vmax.f32 %v3950_v21, 0.0  ;;  %v2900_v21 = vld [vmem:[%s2851_s20] ss:$0 sm:$0xff]  ;;  %s3906_s20 = smov 20  }
  0xe1   :  { %v298_v25 = vmax.f32 %v3952_v23, 0.0  ;;  %v3228_v26 = vpop.f32.mrb[2].mxu0  ;;  %s2861_s23 = sld [smem:[%s4528_s0 + %s3906_s20]]  }
  0xe2   :  { %v3956_v27 = vadd.f32 %v3228_v26, %v2877_v19  ;;  %v289_v28 = vpop.f32.mrb[3].mxu0  ;;  %v4075_v26 = vpop.permute.xlu0 %345 }
  0xe3   :  { %v3958_v29 = vadd.f32 %v2877_v19, %v289_v28  ;;  %v3581_v30 = vpack.c.bf16 %v299_v24, %v298_v25  ;;  %v377_v0 = vmul.f32 %v2882_v56, %v4075_v26 }
  0xe4   :  { %v301_v31 = vmax.f32 %v3956_v27, 0.0 }
  0xe5   :  { %v300_v32 = vmax.f32 %v3958_v29, 0.0  ;;  %3582 = vmatprep.subr.bf16.mxu1 %v3581_v30 }
  0xe6   :  { %3584 = vmatpush3.bf16.msra.mxu1 %v3581_v30  ;;  %v393_v30 = vadd.f32 %v4058_v61, %v374_v9 }
  0xe7   :  { %v3585_v33 = vpack.c.bf16 %v301_v31, %v300_v32 }
  0xe9   :  { %3586 = vmatprep.subr.bf16.mxu1 %v3585_v33 }
  0xea   :  { %3588 = vmatpush3.bf16.msra.mxu1 %v3585_v33  ;;  %v375_v33 = vmul.f32 %v2882_v56, %v4066_v4 }
  0xeb   :  { %3614 = vmatprep.subr.bf16.mxu1 %v3613_v49 }
  0xed   :  { %3238 = vmatmul.mubr.msk.f32.vlgmr.msra.gmra.mrb[0].mxu1 %vm400_vm1, %v3971_v34 }
  0xee   :  { %3240 = vmatprep.mubr.msk.f32.mxu1 %vm400_vm1, %v3974_v35  ;;  %3616 = vmatpush3.bf16.msra.mxu1 %v3613_v49 }
  0xef   :  { %3618 = vmatprep.subr.bf16.mxu1 %v3617_v51 }
  0xf1   :  { %3241 = vmatmul.mubr.msk.f32.gmra.mrb[2].mxu1 %vm400_vm1, %v3981_v36 }
  0xf2   :  { %3243 = vmatprep.mubr.msk.f32.mxu1 %vm400_vm1, %v3984_v37  ;;  %3620 = vmatpush3.bf16.msra.mxu1 %v3617_v51 }
  0xf5   :  { %3244 = vmatmul.mubr.msk.f32.gmra.mrb[4].mxu1 %vm400_vm1, %v3991_v38 }
  0xf6   :  { %3246 = vmatprep.mubr.msk.f32.mxu1 %vm400_vm1, %v3994_v39 }
  0xf9   :  { %3247 = vmatmul.mubr.msk.f32.gmra.mrb[6].mxu1 %vm400_vm1, %v4001_v40 }
  0xfa   :  { %3249 = vmatprep.mubr.msk.f32.mxu1 %vm400_vm1, %v4004_v41 }
  0xfd   :  { %3250 = vmatmul.mubr.msk.f32.gmra.mrb[8].mxu1 %vm400_vm1, %v4011_v42 }
  0xfe   :  { %3252 = vmatprep.mubr.msk.f32.mxu1 %vm400_vm1, %v4014_v43 }
 0x101   :  { %3253 = vmatmul.mubr.msk.f32.gmra.mrb[10].mxu1 %vm400_vm1, %v4021_v44 }
 0x1c0   :  { %v3239_v2 = vpop.f32.mrb[0].mxu1 }
 0x1c1   :  { %v509_v6 = vadd.f32 %v3239_v2, %v389_v63  ;;  %v503_v7 = vpop.f32.mrb[1].mxu1  ;;  %v395_v63 = vadd.f32 %v4058_v61, %v376_v22  ;;  %v4083_v2 = vpop.permute.xlu1 %360 }
 0x1c2   :  { %v504_v8 = vadd.f32 %v503_v7, %v388_v3  ;;  %v394_v7 = vadd.f32 %v4058_v61, %v375_v33 }
 0x1c3   :  { %v563_v10 = vmax.f32 %v509_v6, 0.0 }
 0x1c4   :  { %v562_v13 = vmax.f32 %v504_v8, 0.0  ;;  %v3242_v14 = vpop.f32.mrb[2].mxu1  ;;  %v4086_v8 = vpop.permute.xlu0 %355 }
 0x1c5   :  { %v519_v16 = vadd.f32 %v3242_v14, %v391_v11  ;;  %v513_v17 = vpop.f32.mrb[3].mxu1 }
 0x1c6   :  { %v3589_v19 = vpack.c.bf16 %v563_v10, %v562_v13  ;;  %v514_v20 = vadd.f32 %v513_v17, %v390_v15  ;;  %v380_v13 = vmul.f32 %v2882_v56, %v4083_v2  ;;  %v397_v15 = vadd.f32 %v4058_v61, %v378_v60 }
 0x1c7   :  { %v565_v28 = vmax.f32 %v519_v16, 0.0  ;;  %v379_v16 = vmul.f32 %v2882_v56, %v4086_v8 }
 0x1c8   :  { %v564_v46 = vmax.f32 %v514_v20, 0.0  ;;  %v3245_v47 = vpop.f32.mrb[4].mxu1  ;;  %3590 = vmatprep.subr.bf16.mxu0 %v3589_v19  ;;  %v396_v20 = vadd.f32 %v4058_v61, %v377_v0 }
 0x1c9   :  { %v529_v49 = vadd.f32 %v3245_v47, %v393_v30  ;;  %v523_v50 = vpop.f32.mrb[5].mxu1  ;;  %3592 = vmatpush3.bf16.msra.mxu0 %v3589_v19  ;;  %v399_v47 = vadd.f32 %v4058_v61, %v380_v13  ;;  %v398_v56 = vadd.f32 %v4058_v61, %v379_v16  ;;  %v4105_v61 = vld [vmem:[%s4028_s25 + $0x18] sm:$0xff] }
 0x1ca   :  { %v3593_v51 = vpack.c.bf16 %v565_v28, %v564_v46  ;;  %v524_v58 = vadd.f32 %v523_v50, %v392_v48 }
 0x1cb   :  { %v567_v62 = vmax.f32 %v529_v49, 0.0 }
 0x1cc   :  { %v566_v3 = vmax.f32 %v524_v58, 0.0  ;;  %v3248_v6 = vpop.f32.mrb[6].mxu1  ;;  %3594 = vmatprep.subr.bf16.mxu0 %v3593_v51 }
 0x1cd   :  { %v539_v9 = vadd.f32 %v3248_v6, %v395_v63  ;;  %v533_v10 = vpop.f32.mrb[7].mxu1  ;;  %3596 = vmatpush3.bf16.msra.mxu0 %v3593_v51  ;;  %v4098_v6 = vld [vmem:[%s4028_s25 + $0x10] sm:$0xff] }
 0x1ce   :  { %v3597_v11 = vpack.c.bf16 %v567_v62, %v566_v3  ;;  %v534_v12 = vadd.f32 %v533_v10, %v394_v7  ;;  %v4095_v3 = vld [vmem:[%s4028_s25 + $0x8] sm:$0xff]  ;;  %v780_v7 = vld [vmem:[%s2852_s11] sm:$0xff]  ;;  %s3900_s25 = smov 16  }
 0x1cf   :  { %v569_v14 = vmax.f32 %v539_v9, 0.0  ;;  %v781_v9 = vld [vmem:[%s2852_s11 + $0x8] sm:$0xff]  ;;  %s2857_s28 = sld [smem:[%s4528_s0 + %s3900_s25]]   ;;  %s3922_s25 = smov 35  }
 0x1d0   :  { %v568_v17 = vmax.f32 %v534_v12, 0.0  ;;  %v3251_v19 = vpop.f32.mrb[8].mxu1  ;;  %3598 = vmatprep.subr.bf16.mxu0 %v3597_v11  ;;  %v3621_v10 = vpack.c.bf16 %v781_v9, %v780_v7  ;;  %v890_v12 = vld [vmem:[%s2853_s16 + $0x8] sm:$0xff] }
 0x1d1   :  { %v549_v22 = vadd.f32 %v3251_v19, %v397_v15  ;;  %v543_v28 = vpop.f32.mrb[9].mxu1  ;;  %3600 = vmatpush3.bf16.msra.mxu0 %v3597_v11  ;;  %v889_v11 = vld [vmem:[%s2853_s16] sm:$0xff]  ;;  %v783_v15 = vld [vmem:[%s2852_s11 + $0x18] sm:$0xff] }
 0x1d2   :  { %v3601_v30 = vpack.c.bf16 %v569_v14, %v568_v17  ;;  %v544_v33 = vadd.f32 %v543_v28, %v396_v20  ;;  %3622 = vmatprep.subr.bf16.mxu1 %v3621_v10  ;;  %v3629_v13 = vpack.c.bf16 %v890_v12, %v889_v11  ;;  %v782_v14 = vld [vmem:[%s2852_s11 + $0x10] sm:$0xff]  ;;  %s3904_s11 = smov 19  }
 0x1d3   :  { %v571_v46 = vmax.f32 %v549_v22, 0.0  ;;  %v3625_v19 = vpack.c.bf16 %v783_v15, %v782_v14  ;;  %v891_v28 = vld [vmem:[%s2853_s16 + $0x10] sm:$0xff]  ;;  %s2860_s15 = sld [smem:[%s4528_s0 + %s3904_s11]]  }
 0x1d4   :  { %v570_v48 = vmax.f32 %v544_v33, 0.0  ;;  %v3254_v49 = vpop.f32.mrb[10].mxu1  ;;  %3602 = vmatprep.subr.bf16.mxu0 %v3601_v30 }
 0x1d5   :  { %v559_v50 = vadd.f32 %v3254_v49, %v399_v47  ;;  %v553_v51 = vpop.f32.mrb[11].mxu1  ;;  %3604 = vmatpush3.bf16.msra.mxu0 %v3601_v30  ;;  %v892_v30 = vld [vmem:[%s2853_s16 + $0x18] sm:$0xff]  ;;  %s3905_s16 = smov 17  }
 0x1d6   :  { %v3605_v58 = vpack.c.bf16 %v571_v46, %v570_v48  ;;  %v554_v60 = vadd.f32 %v553_v51, %v398_v56  ;;  %v3633_v23 = vpack.c.bf16 %v892_v30, %v891_v28  ;;  %v1266_v28 = vld [vmem:[%s2857_s28 + $0x8] sm:$0xff]  ;;  %v1267_v30 = vld [vmem:[%s2857_s28 + $0x10] sm:$0xff]  ;;  %s2858_s19 = sld [smem:[%s4528_s0 + %s3905_s16]]  }
 0x1d7   :  { %v573_v62 = vmax.f32 %v559_v50, 0.0  ;;  %v2909_v50 = vld [vmem:[%s2854_s24] ss:$0 sm:$0xff]  ;;  %s3907_s24 = smov 23  }
 0x1d8   :  { %v572_v63 = vmax.f32 %v554_v60, 0.0  ;;  %3606 = vmatprep.subr.bf16.mxu0 %v3605_v58  ;;  %s2864_s27 = sld [smem:[%s4528_s0 + %s3907_s24]]  }
 0x1d9   :  { %3608 = vmatpush3.bf16.msra.mxu0 %v3605_v58 }
 0x1da   :  { %v3609_v0 = vpack.c.bf16 %v573_v62, %v572_v63 }
 0x1dc   :  { %3610 = vmatprep.subr.bf16.mxu0 %v3609_v0 }
 0x1dd   :  { %3612 = vmatpush3.bf16.msra.mxu0 %v3609_v0 }
 0x1de   :  { %3630 = vmatprep.subr.bf16.mxu0 %v3629_v13 }
 0x1e0   :  { %3280 = vmatmul.mubr.msk.f32.vlgmr.msra.gmra.mrb[4].mxu0 %vm574_vm2, %v4095_v3 }
 0x1e1   :  { %3282 = vmatprep.mubr.msk.f32.mxu0 %vm574_vm2, %v4098_v6  ;;  %3632 = vmatpush3.bf16.msra.mxu0 %v3629_v13 }
 0x1e2   :  { %3634 = vmatprep.subr.bf16.mxu0 %v3633_v23 }
 0x1e4   :  { %3283 = vmatmul.mubr.msk.f32.gmra.mrb[6].mxu0 %vm574_vm2, %v4105_v61 }
 0x1e5   :  { %3636 = vmatpush3.bf16.msra.mxu0 %v3633_v23 }
 0x2b3   :  { %v3281_v16 = vpop.f32.mrb[4].mxu0 }
 0x2b4   :  { %v653_v17 = vpop.f32.mrb[5].mxu0 }
 0x2b5   :  { %3293 = vmatprep.mubr.msk.f32.mxu1 %vm400_vm1, %v653_v17 }
 0x2b6   :  { %3294 = vmatmul.mubr.msk.f32.vlgmr.msra.gmra.mrb[12].mxu1 %vm400_vm1, %v3281_v16 }
 0x2b7   :  { %v3284_v20 = vpop.f32.mrb[6].mxu0  ;;  %3624 = vmatpush3.bf16.msra.mxu1 %v3621_v10 }
 0x2b8   :  { %v663_v22 = vpop.f32.mrb[7].mxu0  ;;  %3626 = vmatprep.subr.bf16.mxu1 %v3625_v19 }
 0x2b9   :  { %3296 = vmatprep.mubr.msk.f32.mxu1 %vm400_vm1, %v663_v22  ;;  %v1265_v22 = vld [vmem:[%s2857_s28] sm:$0xff] }
 0x2ba   :  { %3297 = vmatmul.mubr.msk.f32.gmra.mrb[14].mxu1 %vm400_vm1, %v3284_v20  ;;  %v3669_v23 = vpack.c.bf16 %v1266_v28, %v1265_v22 }
 0x2bb   :  { %3628 = vmatpush3.bf16.msra.mxu1 %v3625_v19  ;;  %3307 = vmatprep.mubr.msk.f32.mxu1 %vm400_vm1, %v298_v25 }
 0x2be   :  { %3308 = vmatmul.mubr.msk.f32.vlgmr.msra.gmra.mrb[12].mxu1 %vm400_vm1, %v299_v24 }
 0x2bf   :  { %3310 = vmatprep.mubr.msk.f32.mxu1 %vm400_vm1, %v300_v32 }
 0x2c2   :  { %3311 = vmatmul.mubr.msk.f32.gmra.mrb[14].mxu1 %vm400_vm1, %v301_v31 }
 0x2c3   :  { %3377 = vmatprep.mubr.msk.f32.mxu1 %vm574_vm2, %v4031_v45 }
 0x391   :  { %v3309_v24 = vpop.f32.mrb[12].mxu1 }
 0x392   :  { %v3765_v25 = vadd.f32 %v3309_v24, %v2900_v21  ;;  %v862_v29 = vpop.f32.mrb[13].mxu1 }
 0x393   :  { %v3766_v27 = vadd.f32 %v2900_v21, %v862_v29 }
 0x394   :  { %v886_v33 = vmax.f32 %v3765_v25, 0.0  ;;  %v2914_v25 = vld [vmem:[%s2855_s2] ss:$0 sm:$0xff]  ;;  %s3909_s2 = smov 22  }
 0x395   :  { %v885_v32 = vmax.f32 %v3766_v27, 0.0  ;;  %v3312_v31 = vpop.f32.mrb[14].mxu1  ;;  %v1013_v29 = vmul.f32 %v2914_v25, %v4050_v55  ;;  %v1012_v27 = vmul.f32 %v2914_v25, %v4040_v53  ;;  %v1018_v22 = vmul.f32 %v2914_v25, %v4066_v4  ;;  %s2863_s5 = sld [smem:[%s4528_s0 + %s3909_s2]]  }
 0x396   :  { %v3767_v46 = vadd.f32 %v3312_v31, %v2900_v21  ;;  %v872_v47 = vpop.f32.mrb[15].mxu1  ;;  %v1015_v31 = vmul.f32 %v2914_v25, %v4045_v54 }
 0x397   :  { %v3768_v48 = vadd.f32 %v2900_v21, %v872_v47  ;;  %3321 = vmatprep.mubr.msk.f32.mxu0 %vm400_vm1, %v885_v32  ;;  %v1268_v21 = vld [vmem:[%s2857_s28 + $0x18] sm:$0xff]  ;;  %v4190_v32 = vld [vmem:[%s2856_s6] ss:$0 sm:$0xff]  ;;  %s3908_s28 = smov 21   ;;  %s3910_s6 = smov 25  }
 0x398   :  { %3322 = vmatmul.mubr.msk.f32.vlgmr.msra.gmra.mrb[8].mxu0 %vm400_vm1, %v886_v33  ;;  %v888_v56 = vmax.f32 %v3767_v46, 0.0  ;;  %v3673_v24 = vpack.c.bf16 %v1268_v21, %v1267_v30  ;;  %v1032_v33 = vadd.f32 %v4190_v32, %v1013_v29  ;;  %v1014_v46 = vmul.f32 %v2914_v25, %v4038_v52  ;;  %s2862_s1 = sld [smem:[%s4528_s0 + %s3908_s28]]  }
 0x399   :  { %v887_v49 = vmax.f32 %v3768_v48, 0.0  ;;  %v1031_v48 = vadd.f32 %v4190_v32, %v1012_v27  ;;  %s2866_s9 = sld [smem:[%s4528_s0 + %s3910_s6]]  }
 0x39a   :  { %s4495_s28 = sld [smem:[%s4528_s0 + %s3922_s25]]  }
 0x39b   :  { %3324 = vmatprep.mubr.msk.f32.mxu0 %vm400_vm1, %v887_v49 }
 0x39c   :  { %3325 = vmatmul.mubr.msk.f32.gmra.mrb[10].mxu0 %vm400_vm1, %v888_v56 }
 0x39d   :  { %3335 = vmatprep.mubr.msk.f32.mxu0 %vm400_vm1, %v3940_v5 }
 0x46b   :  { %v3323_v51 = vpop.f32.mrb[8].mxu0 }
 0x46c   :  { %v984_v58 = vadd.f32 %v3323_v51, %v2909_v50  ;;  %v978_v60 = vpop.f32.mrb[9].mxu0  ;;  %v1017_v51 = vmul.f32 %v2914_v25, %v4052_v57 }
 0x46d   :  { %v979_v62 = vadd.f32 %v2909_v50, %v978_v60  ;;  %v1034_v60 = vadd.f32 %v4190_v32, %v1015_v31  ;;  %v1021_v31 = vmul.f32 %v2914_v25, %v4072_v18 }
 0x46e   :  { %v998_v63 = vmul.f32 0.01, %v984_v58 }
 0x46f   :  { %v997_v0 = vmul.f32 0.01, %v979_v62  ;;  %v3326_v7 = vpop.f32.mrb[10].mxu0 }
 0x470   :  { %v4145_v9 = vmax.f32 %v984_v58, %v998_v63  ;;  %v994_v10 = vadd.f32 %v3326_v7, %v2909_v50  ;;  %v988_v11 = vpop.f32.mrb[11].mxu0  ;;  %v1033_v7 = vadd.f32 %v4190_v32, %v1014_v46 }
 0x471   :  { %v4147_v12 = vmax.f32 %v979_v62, %v997_v0  ;;  %v989_v13 = vadd.f32 %v2909_v50, %v988_v11  ;;  %v1016_v62 = vmul.f32 %v2914_v25, %v4055_v59 }
 0x472   :  { %v1000_v14 = vmul.f32 0.01, %v994_v10 }
 0x473   :  { %v999_v15 = vmul.f32 0.01, %v989_v13  ;;  %v3637_v16 = vpack.c.bf16 %v4145_v9, %v4147_v12 }
 0x474   :  { %v4151_v17 = vmax.f32 %v994_v10, %v1000_v14 }
 0x475   :  { %v4153_v19 = vmax.f32 %v989_v13, %v999_v15  ;;  %3638 = vmatprep.subr.bf16.mxu0 %v3637_v16  ;;  %v1019_v15 = vmul.f32 %v2914_v25, %v4063_v1 }
 0x476   :  { %3640 = vmatpush3.bf16.msra.mxu0 %v3637_v16 }
 0x477   :  { %v3641_v20 = vpack.c.bf16 %v4151_v17, %v4153_v19  ;;  %v1038_v46 = vadd.f32 %v4190_v32, %v1019_v15 }
 0x479   :  { %3642 = vmatprep.subr.bf16.mxu0 %v3641_v20 }
 0x47a   :  { %3644 = vmatpush3.bf16.msra.mxu0 %v3641_v20  ;;  %v1036_v20 = vadd.f32 %v4190_v32, %v1017_v51 }
 0x47b   :  { %3670 = vmatprep.subr.bf16.mxu0 %v3669_v23 }
 0x47d   :  { %3336 = vmatmul.mubr.msk.f32.vlgmr.msra.gmra.mrb[12].mxu0 %vm400_vm1, %v3971_v34 }
 0x47e   :  { %3338 = vmatprep.mubr.msk.f32.mxu0 %vm400_vm1, %v3974_v35  ;;  %3672 = vmatpush3.bf16.msra.mxu0 %v3669_v23  ;;  %v1035_v23 = vadd.f32 %v4190_v32, %v1016_v62  ;;  %v1023_v62 = vmul.f32 %v2914_v25, %v4083_v2 }
 0x47f   :  { %3674 = vmatprep.subr.bf16.mxu0 %v3673_v24 }
 0x481   :  { %3339 = vmatmul.mubr.msk.f32.gmra.mrb[14].mxu0 %vm400_vm1, %v3981_v36 }
 0x482   :  { %3341 = vmatprep.mubr.msk.f32.mxu0 %vm400_vm1, %v3984_v37  ;;  %3676 = vmatpush3.bf16.msra.mxu0 %v3673_v24 }
 0x485   :  { %3342 = vmatmul.mubr.msk.f32.gmra.mrb[16].mxu0 %vm400_vm1, %v3991_v38 }
 0x486   :  { %3344 = vmatprep.mubr.msk.f32.mxu0 %vm400_vm1, %v3994_v39 }
 0x489   :  { %3345 = vmatmul.mubr.msk.f32.gmra.mrb[18].mxu0 %vm400_vm1, %v4001_v40 }
 0x48a   :  { %3347 = vmatprep.mubr.msk.f32.mxu0 %vm400_vm1, %v4004_v41 }
 0x48d   :  { %3348 = vmatmul.mubr.msk.f32.gmra.mrb[20].mxu0 %vm400_vm1, %v4011_v42 }
 0x48e   :  { %3350 = vmatprep.mubr.msk.f32.mxu0 %vm400_vm1, %v4014_v43 }
 0x491   :  { %3351 = vmatmul.mubr.msk.f32.gmra.mrb[22].mxu0 %vm400_vm1, %v4021_v44 }
 0x550   :  { %v3337_v47 = vpop.f32.mrb[12].mxu0 }
 0x551   :  { %v1115_v49 = vadd.f32 %v3337_v47, %v1032_v33  ;;  %v1109_v56 = vpop.f32.mrb[13].mxu0  ;;  %v1020_v47 = vmul.f32 %v2914_v25, %v4075_v26 }
 0x552   :  { %v1110_v50 = vadd.f32 %v1109_v56, %v1031_v48  ;;  %v1037_v56 = vadd.f32 %v4190_v32, %v1018_v22 }
 0x553   :  { %v1169_v58 = vmax.f32 %v1115_v49, 0.0 }
 0x554   :  { %v1168_v63 = vmax.f32 %v1110_v50, 0.0  ;;  %v3340_v0 = vpop.f32.mrb[14].mxu0 }
 0x555   :  { %v1125_v10 = vadd.f32 %v3340_v0, %v1034_v60  ;;  %v1119_v11 = vpop.f32.mrb[15].mxu0  ;;  %v1040_v0 = vadd.f32 %v4190_v32, %v1021_v31 }
 0x556   :  { %v3645_v13 = vpack.c.bf16 %v1169_v58, %v1168_v63  ;;  %v1120_v14 = vadd.f32 %v1119_v11, %v1033_v7  ;;  %v1022_v7 = vmul.f32 %v2914_v25, %v4086_v8 }
 0x557   :  { %v1171_v16 = vmax.f32 %v1125_v10, 0.0 }
 0x558   :  { %v1170_v28 = vmax.f32 %v1120_v14, 0.0  ;;  %v3343_v30 = vpop.f32.mrb[16].mxu0  ;;  %3646 = vmatprep.subr.bf16.mxu1 %v3645_v13 }
 0x559   :  { %v1135_v21 = vadd.f32 %v3343_v30, %v1036_v20  ;;  %v1129_v24 = vpop.f32.mrb[17].mxu0  ;;  %3648 = vmatpush3.bf16.msra.mxu1 %v3645_v13  ;;  %v1039_v13 = vadd.f32 %v4190_v32, %v1020_v47  ;;  %v1374_v47 = vld [vmem:[%s2859_s10 + $0x8] sm:$0xff] }
 0x55a   :  { %v3649_v29 = vpack.c.bf16 %v1171_v16, %v1170_v28  ;;  %v1130_v27 = vadd.f32 %v1129_v24, %v1035_v23  ;;  %v1042_v28 = vadd.f32 %v4190_v32, %v1023_v62 }
 0x55b   :  { %v1173_v33 = vmax.f32 %v1135_v21, 0.0  ;;  %v1041_v21 = vadd.f32 %v4190_v32, %v1022_v7  ;;  %v1373_v32 = vld [vmem:[%s2859_s10] sm:$0xff] }
 0x55c   :  { %v1172_v48 = vmax.f32 %v1130_v27, 0.0  ;;  %v3346_v49 = vpop.f32.mrb[18].mxu0  ;;  %3650 = vmatprep.subr.bf16.mxu1 %v3649_v29 }
 0x55d   :  { %v1145_v50 = vadd.f32 %v3346_v49, %v1038_v46  ;;  %v1139_v51 = vpop.f32.mrb[19].mxu0  ;;  %3652 = vmatpush3.bf16.msra.mxu1 %v3649_v29  ;;  %v1482_v49 = vld [vmem:[%s2860_s15] sm:$0xff] }
 0x55e   :  { %v3653_v58 = vpack.c.bf16 %v1173_v33, %v1172_v48  ;;  %v1140_v60 = vadd.f32 %v1139_v51, %v1037_v56  ;;  %v3677_v48 = vpack.c.bf16 %v1374_v47, %v1373_v32  ;;  %v1483_v56 = vld [vmem:[%s2860_s15 + $0x8] sm:$0xff]  ;;  %v1375_v51 = vld [vmem:[%s2859_s10 + $0x10] sm:$0xff] }
 0x55f   :  { %v1175_v63 = vmax.f32 %v1145_v50, 0.0  ;;  %v3685_v50 = vpack.c.bf16 %v1483_v56, %v1482_v49 }
 0x560   :  { %v1174_v10 = vmax.f32 %v1140_v60, 0.0  ;;  %v3349_v11 = vpop.f32.mrb[20].mxu0  ;;  %3654 = vmatprep.subr.bf16.mxu1 %v3653_v58  ;;  %3678 = vmatprep.subr.bf16.mxu0 %v3677_v48 }
 0x561   :  { %v1155_v14 = vadd.f32 %v3349_v11, %v1040_v0  ;;  %v1149_v15 = vpop.f32.mrb[21].mxu0  ;;  %3656 = vmatpush3.bf16.msra.mxu1 %v3653_v58  ;;  %v1376_v58 = vld [vmem:[%s2859_s10 + $0x18] sm:$0xff]  ;;  %s3911_s10 = smov 26  }
 0x562   :  { %v3657_v16 = vpack.c.bf16 %v1175_v63, %v1174_v10  ;;  %v1150_v20 = vadd.f32 %v1149_v15, %v1039_v13  ;;  %v3681_v63 = vpack.c.bf16 %v1376_v58, %v1375_v51  ;;  %v1484_v10 = vld [vmem:[%s2860_s15 + $0x10] sm:$0xff]  ;;  %v1485_v11 = vld [vmem:[%s2860_s15 + $0x18] sm:$0xff]  ;;  %s2867_s14 = sld [smem:[%s4528_s0 + %s3911_s10]]   ;;  %s3912_s15 = smov 24  }
 0x563   :  { %v1177_v22 = vmax.f32 %v1155_v14, 0.0  ;;  %v3689_v13 = vpack.c.bf16 %v1485_v11, %v1484_v10  ;;  %s2865_s18 = sld [smem:[%s4528_s0 + %s3912_s15]]  }
 0x564   :  { %v1176_v30 = vmax.f32 %v1150_v20, 0.0  ;;  %v3352_v23 = vpop.f32.mrb[22].mxu0  ;;  %3658 = vmatprep.subr.bf16.mxu1 %v3657_v16 }
 0x565   :  { %v1165_v24 = vadd.f32 %v3352_v23, %v1042_v28  ;;  %v1159_v25 = vpop.f32.mrb[23].mxu0  ;;  %3660 = vmatpush3.bf16.msra.mxu1 %v3657_v16 }
 0x566   :  { %v3661_v29 = vpack.c.bf16 %v1177_v22, %v1176_v30  ;;  %v1160_v27 = vadd.f32 %v1159_v25, %v1041_v21  ;;  %v2941_v21 = vld [vmem:[%s2861_s23] ss:$0 sm:$0xff]  ;;  %s3914_s23 = smov 27  }
 0x567   :  { %v1179_v31 = vmax.f32 %v1165_v24, 0.0  ;;  %s2868_s26 = sld [smem:[%s4528_s0 + %s3914_s23]]  }
 0x568   :  { %v1178_v33 = vmax.f32 %v1160_v27, 0.0  ;;  %3662 = vmatprep.subr.bf16.mxu1 %v3661_v29 }
 0x569   :  { %3664 = vmatpush3.bf16.msra.mxu1 %v3661_v29 }
 0x56a   :  { %v3665_v46 = vpack.c.bf16 %v1179_v31, %v1178_v33 }
 0x56c   :  { %3666 = vmatprep.subr.bf16.mxu1 %v3665_v46 }
 0x56d   :  { %3668 = vmatpush3.bf16.msra.mxu1 %v3665_v46 }
 0x56e   :  { %3686 = vmatprep.subr.bf16.mxu1 %v3685_v50 }
 0x570   :  { %3378 = vmatmul.mubr.msk.f32.vlgmr.msra.gmra.mrb[16].mxu1 %vm574_vm2, %v4095_v3 }
 0x571   :  { %3380 = vmatprep.mubr.msk.f32.mxu1 %vm574_vm2, %v4098_v6  ;;  %3688 = vmatpush3.bf16.msra.mxu1 %v3685_v50 }
 0x572   :  { %3690 = vmatprep.subr.bf16.mxu1 %v3689_v13 }
 0x574   :  { %3381 = vmatmul.mubr.msk.f32.gmra.mrb[18].mxu1 %vm574_vm2, %v4105_v61 }
 0x575   :  { %3692 = vmatpush3.bf16.msra.mxu1 %v3689_v13 }
 0x643   :  { %v3379_v60 = vpop.f32.mrb[16].mxu1 }
 0x644   :  { %v1246_v62 = vpop.f32.mrb[17].mxu1 }
 0x645   :  { %3391 = vmatprep.mubr.msk.f32.mxu0 %vm400_vm1, %v1246_v62 }
 0x646   :  { %3392 = vmatmul.mubr.msk.f32.vlgmr.msra.gmra.mrb[24].mxu0 %vm400_vm1, %v3379_v60 }
 0x647   :  { %v3382_v0 = vpop.f32.mrb[18].mxu1  ;;  %3680 = vmatpush3.bf16.msra.mxu0 %v3677_v48 }
 0x648   :  { %v1256_v7 = vpop.f32.mrb[19].mxu1  ;;  %3682 = vmatprep.subr.bf16.mxu0 %v3681_v63 }
 0x649   :  { %3394 = vmatprep.mubr.msk.f32.mxu0 %vm400_vm1, %v1256_v7 }
 0x64a   :  { %3395 = vmatmul.mubr.msk.f32.gmra.mrb[26].mxu0 %vm400_vm1, %v3382_v0 }
 0x64b   :  { %3684 = vmatpush3.bf16.msra.mxu0 %v3681_v63  ;;  %3405 = vmatprep.mubr.msk.f32.mxu0 %vm400_vm1, %v4147_v12 }
 0x64e   :  { %3406 = vmatmul.mubr.msk.f32.vlgmr.msra.gmra.mrb[24].mxu0 %vm400_vm1, %v4145_v9  ;;  %v2932_v9 = vld [vmem:[%s2858_s19] ss:$0 sm:$0xff]  ;;  %s3913_s19 = smov 28  }
 0x64f   :  { %3408 = vmatprep.mubr.msk.f32.mxu0 %vm400_vm1, %v4153_v19  ;;  %s2869_s22 = sld [smem:[%s4528_s0 + %s3913_s19]]  }
 0x652   :  { %3409 = vmatmul.mubr.msk.f32.gmra.mrb[26].mxu0 %vm400_vm1, %v4151_v17 }
 0x653   :  { %3475 = vmatprep.mubr.msk.f32.mxu0 %vm574_vm2, %v4031_v45 }
 0x721   :  { %v3407_v12 = vpop.f32.mrb[24].mxu0 }
 0x722   :  { %v3769_v14 = vadd.f32 %v3407_v12, %v2932_v9  ;;  %v1455_v19 = vpop.f32.mrb[25].mxu0 }
 0x723   :  { %v3770_v15 = vadd.f32 %v2932_v9, %v1455_v19 }
 0x724   :  { %v1479_v20 = vmax.f32 %v3769_v14, 0.0 }
 0x725   :  { %v1478_v16 = vmax.f32 %v3770_v15, 0.0  ;;  %v3410_v17 = vpop.f32.mrb[26].mxu0 }
 0x726   :  { %v3771_v22 = vadd.f32 %v3410_v17, %v2932_v9  ;;  %v1465_v45 = vpop.f32.mrb[27].mxu0 }
 0x727   :  { %v3772_v28 = vadd.f32 %v2932_v9, %v1465_v45  ;;  %3419 = vmatprep.mubr.msk.f32.mxu1 %vm400_vm1, %v1478_v16 }
 0x728   :  { %3420 = vmatmul.mubr.msk.f32.vlgmr.msra.gmra.mrb[20].mxu1 %vm400_vm1, %v1479_v20  ;;  %v1481_v23 = vmax.f32 %v3771_v22, 0.0 }
 0x729   :  { %v1480_v30 = vmax.f32 %v3772_v28, 0.0 }
 0x72b   :  { %3422 = vmatprep.mubr.msk.f32.mxu1 %vm400_vm1, %v1480_v30 }
 0x72c   :  { %3423 = vmatmul.mubr.msk.f32.gmra.mrb[22].mxu1 %vm400_vm1, %v1481_v23 }
 0x72d   :  { %3433 = vmatprep.mubr.msk.f32.mxu1 %vm400_vm1, %v3940_v5 }
 0x7fb   :  { %v3421_v24 = vpop.f32.mrb[20].mxu1 }
 0x7fc   :  { %v1577_v25 = vadd.f32 %v3421_v24, %v2941_v21  ;;  %v1571_v29 = vpop.f32.mrb[21].mxu1 }
 0x7fd   :  { %v1572_v27 = vadd.f32 %v2941_v21, %v1571_v29 }
 0x7fe   :  { %v1591_v31 = vmul.f32 0.01, %v1577_v25 }
 0x7ff   :  { %v1590_v33 = vmul.f32 0.01, %v1572_v27  ;;  %v3424_v46 = vpop.f32.mrb[22].mxu1 }
 0x800   :  { %v4252_v32 = vmax.f32 %v1577_v25, %v1591_v31  ;;  %v1587_v47 = vadd.f32 %v3424_v46, %v2941_v21  ;;  %v1581_v48 = vpop.f32.mrb[23].mxu1 }
 0x801   :  { %v4254_v49 = vmax.f32 %v1572_v27, %v1590_v33  ;;  %v1582_v5 = vadd.f32 %v2941_v21, %v1581_v48 }
 0x802   :  { %v1593_v56 = vmul.f32 0.01, %v1587_v47 }
 0x803   :  { %v1592_v50 = vmul.f32 0.01, %v1582_v5  ;;  %v3693_v51 = vpack.c.bf16 %v4252_v32, %v4254_v49 }
 0x804   :  { %v4258_v58 = vmax.f32 %v1587_v47, %v1593_v56 }
 0x805   :  { %v4260_v60 = vmax.f32 %v1582_v5, %v1592_v50  ;;  %3694 = vmatprep.subr.bf16.mxu1 %v3693_v51 }
 0x806   :  { %3696 = vmatpush3.bf16.msra.mxu1 %v3693_v51 }
 0x807   :  { %v3697_v62 = vpack.c.bf16 %v4258_v58, %v4260_v60 }
 0x809   :  { %3698 = vmatprep.subr.bf16.mxu1 %v3697_v62 }
 0x80a   :  { %3700 = vmatpush3.bf16.msra.mxu1 %v3697_v62 }
 0x80d   :  { %3434 = vmatmul.mubr.msk.f32.vlgmr.msra.gmra.mrb[24].mxu1 %vm400_vm1, %v3971_v34  ;;  %v1858_v34 = vld [vmem:[%s2864_s27] sm:$0xff] }
 0x80e   :  { %3436 = vmatprep.mubr.msk.f32.mxu1 %vm400_vm1, %v3974_v35  ;;  %v1859_v35 = vld [vmem:[%s2864_s27 + $0x8] sm:$0xff] }
 0x811   :  { %3437 = vmatmul.mubr.msk.f32.gmra.mrb[26].mxu1 %vm400_vm1, %v3981_v36  ;;  %v1860_v36 = vld [vmem:[%s2864_s27 + $0x10] sm:$0xff] }
 0x812   :  { %3439 = vmatprep.mubr.msk.f32.mxu1 %vm400_vm1, %v3984_v37  ;;  %v3725_v37 = vpack.c.bf16 %v1859_v35, %v1858_v34 }
 0x814   :  { %3726 = vmatprep.subr.bf16.mxu1 %v3725_v37 }
 0x815   :  { %3440 = vmatmul.mubr.msk.f32.gmra.mrb[28].mxu1 %vm400_vm1, %v3991_v38  ;;  %v1861_v38 = vld [vmem:[%s2864_s27 + $0x18] sm:$0xff]  ;;  %s3915_s27 = smov 3  }
 0x816   :  { %3442 = vmatprep.mubr.msk.f32.mxu1 %vm400_vm1, %v3994_v39  ;;  %v3729_v39 = vpack.c.bf16 %v1861_v38, %v1860_v36  ;;  %3728 = vmatpush3.bf16.msra.mxu1 %v3725_v37  ;;  %s4367_s30 = sld [smem:[%s4528_s0 + %s3915_s27]]  }
 0x818   :  { %3730 = vmatprep.subr.bf16.mxu1 %v3729_v39 }
 0x819   :  { %3443 = vmatmul.mubr.msk.f32.gmra.mrb[30].mxu1 %vm400_vm1, %v4001_v40  ;;  %v2946_v40 = vld [vmem:[%s2862_s1] ss:$0 sm:$0xff]  ;;  %s3916_s1 = smov 29  }
 0x81a   :  { %3445 = vmatprep.mubr.msk.f32.mxu1 %vm400_vm1, %v4004_v41  ;;  %3732 = vmatpush3.bf16.msra.mxu1 %v3729_v39  ;;  %v1606_v41 = vmul.f32 %v2946_v40, %v4050_v55  ;;  %v1607_v0 = vmul.f32 %v2946_v40, %v4038_v52  ;;  %v1610_v12 = vmul.f32 %v2946_v40, %v4052_v57  ;;  %s2870_s4 = sld [smem:[%s4528_s0 + %s3916_s1]]  }
 0x81b   :  { %v1612_v22 = vmul.f32 %v2946_v40, %v4063_v1  ;;  %v1611_v57 = vmul.f32 %v2946_v40, %v4066_v4  ;;  %v1614_v27 = vmul.f32 %v2946_v40, %v4072_v18  ;;  %v1613_v33 = vmul.f32 %v2946_v40, %v4075_v26 }
 0x81c   :  { %v1616_v51 = vmul.f32 %v2946_v40, %v4083_v2  ;;  %v1615_v34 = vmul.f32 %v2946_v40, %v4086_v8 }
 0x81d   :  { %3446 = vmatmul.mubr.msk.f32.gmra.mrb[32].mxu1 %vm400_vm1, %v4011_v42  ;;  %v1605_v42 = vmul.f32 %v2946_v40, %v4040_v53  ;;  %v1609_v53 = vmul.f32 %v2946_v40, %v4055_v59 }
 0x81e   :  { %3448 = vmatprep.mubr.msk.f32.mxu1 %vm400_vm1, %v4014_v43  ;;  %v4297_v43 = vld [vmem:[%s2863_s5] ss:$0 sm:$0xff]  ;;  %s3917_s5 = smov 30  }
 0x81f   :  { %v1625_v63 = vadd.f32 %v4297_v43, %v1606_v41  ;;  %v1624_v10 = vadd.f32 %v4297_v43, %v1605_v42  ;;  %v1629_v28 = vadd.f32 %v4297_v43, %v1610_v12  ;;  %v1628_v59 = vadd.f32 %v4297_v43, %v1609_v53  ;;  %v1967_v12 = vld [vmem:[%s2866_s9 + $0x8] sm:$0xff]  ;;  %v1969_v53 = vld [vmem:[%s2866_s9 + $0x18] sm:$0xff]  ;;  %s2871_s8 = sld [smem:[%s4528_s0 + %s3917_s5]]  }
 0x820   :  { %v1631_v1 = vadd.f32 %v4297_v43, %v1612_v22  ;;  %v1630_v4 = vadd.f32 %v4297_v43, %v1611_v57  ;;  %v1633_v18 = vadd.f32 %v4297_v43, %v1614_v27  ;;  %v1632_v26 = vadd.f32 %v4297_v43, %v1613_v33  ;;  %v2973_v27 = vld [vmem:[%s2868_s26] ss:$0 sm:$0xff] }
 0x821   :  { %3449 = vmatmul.mubr.msk.f32.gmra.mrb[34].mxu1 %vm400_vm1, %v4021_v44  ;;  %v1608_v44 = vmul.f32 %v2946_v40, %v4045_v54  ;;  %v1626_v54 = vadd.f32 %v4297_v43, %v1607_v0  ;;  %v1634_v0 = vadd.f32 %v4297_v43, %v1615_v34 }
 0x823   :  { %v1627_v55 = vadd.f32 %v4297_v43, %v1608_v44  ;;  %v1635_v44 = vadd.f32 %v4297_v43, %v1616_v51  ;;  %v1966_v43 = vld [vmem:[%s2866_s9] sm:$0xff] }
 0x8e0   :  { %v3435_v7 = vpop.f32.mrb[24].mxu1 }
 0x8e1   :  { %v1708_v11 = vadd.f32 %v3435_v7, %v1625_v63  ;;  %v1702_v13 = vpop.f32.mrb[25].mxu1 }
 0x8e2   :  { %v1703_v9 = vadd.f32 %v1702_v13, %v1624_v10 }
 0x8e3   :  { %v1762_v14 = vmax.f32 %v1708_v11, 0.0 }
 0x8e4   :  { %v1761_v19 = vmax.f32 %v1703_v9, 0.0  ;;  %v3438_v15 = vpop.f32.mrb[26].mxu1 }
 0x8e5   :  { %v1718_v16 = vadd.f32 %v3438_v15, %v1627_v55  ;;  %v1712_v17 = vpop.f32.mrb[27].mxu1  ;;  %v2076_v55 = vld [vmem:[%s2867_s14 + $0x8] sm:$0xff] }
 0x8e6   :  { %v3701_v52 = vpack.c.bf16 %v1762_v14, %v1761_v19  ;;  %v1713_v20 = vadd.f32 %v1712_v17, %v1626_v54  ;;  %v3733_v14 = vpack.c.bf16 %v1967_v12, %v1966_v43 }
 0x8e7   :  { %v1764_v45 = vmax.f32 %v1718_v16, 0.0 }
 0x8e8   :  { %v1763_v30 = vmax.f32 %v1713_v20, 0.0  ;;  %v3441_v23 = vpop.f32.mrb[28].mxu1  ;;  %3702 = vmatprep.subr.bf16.mxu0 %v3701_v52  ;;  %3734 = vmatprep.subr.bf16.mxu1 %v3733_v14  ;;  %v2964_v20 = vld [vmem:[%s2865_s18] ss:$0 sm:$0xff]  ;;  %s3920_s18 = smov 33  }
 0x8e9   :  { %v1728_v21 = vadd.f32 %v3441_v23, %v1629_v28  ;;  %v1722_v24 = vpop.f32.mrb[29].mxu1  ;;  %3704 = vmatpush3.bf16.msra.mxu0 %v3701_v52  ;;  %v3875_v52 = vld [vmem:[%s3937_s13] sm:$0xff]  ;;  %s2874_s21 = sld [smem:[%s4528_s0 + %s3920_s18]]  }
 0x8ea   :  { %v3705_v25 = vpack.c.bf16 %v1764_v45, %v1763_v30  ;;  %v1723_v29 = vadd.f32 %v1722_v24, %v1628_v59  ;;  %v2190_v24 = vld [vmem:[%s2869_s22] sm:$0xff] }
 0x8eb   :  { %v1766_v31 = vmax.f32 %v1728_v21, 0.0 }
 0x8ec   :  { %v1765_v46 = vmax.f32 %v1723_v29, 0.0  ;;  %v3444_v47 = vpop.f32.mrb[30].mxu1  ;;  %3706 = vmatprep.subr.bf16.mxu0 %v3705_v25 }
 0x8ed   :  { %v1738_v48 = vadd.f32 %v3444_v47, %v1631_v1  ;;  %v1732_v5 = vpop.f32.mrb[31].mxu1  ;;  %3708 = vmatpush3.bf16.msra.mxu0 %v3705_v25  ;;  %v2191_v25 = vld [vmem:[%s2869_s22 + $0x8] sm:$0xff] }
 0x8ee   :  { %v3709_v56 = vpack.c.bf16 %v1766_v31, %v1765_v46  ;;  %v1733_v50 = vadd.f32 %v1732_v5, %v1630_v4  ;;  %v3745_v29 = vpack.c.bf16 %v2191_v25, %v2190_v24  ;;  %v3882_v24 = vld [vmem:[%s3937_s13 + $0x38] sm:$0xff]  ;;  %v3883_v25 = vld [vmem:[%s3937_s13 + $0x40] sm:$0xff] }
 0x8ef   :  { %v1768_v62 = vmax.f32 %v1738_v48, 0.0 }
 0x8f0   :  { %v1767_v35 = vmax.f32 %v1733_v50, 0.0  ;;  %v3447_v36 = vpop.f32.mrb[32].mxu1  ;;  %3710 = vmatprep.subr.bf16.mxu0 %v3709_v56 }
 0x8f1   :  { %v1748_v37 = vadd.f32 %v3447_v36, %v1633_v18  ;;  %v1742_v38 = vpop.f32.mrb[33].mxu1  ;;  %3712 = vmatpush3.bf16.msra.mxu0 %v3709_v56 }
 0x8f2   :  { %v3713_v39 = vpack.c.bf16 %v1768_v62, %v1767_v35  ;;  %v1743_v41 = vadd.f32 %v1742_v38, %v1632_v26  ;;  %v176_v26 = vld [vmem:[%s4367_s30] sm:$0xff] }
 0x8f3   :  { %v1770_v42 = vmax.f32 %v1748_v37, 0.0  ;;  %v2978_v37 = vld [vmem:[%s2870_s4] ss:$0 sm:$0xff] }
 0x8f4   :  { %v1769_v63 = vmax.f32 %v1743_v41, 0.0  ;;  %v3450_v2 = vpop.f32.mrb[34].mxu1  ;;  %3714 = vmatprep.subr.bf16.mxu0 %v3713_v39 }
 0x8f5   :  { %v1758_v7 = vadd.f32 %v3450_v2, %v1635_v44  ;;  %v1752_v8 = vpop.f32.mrb[35].mxu1  ;;  %3716 = vmatpush3.bf16.msra.mxu0 %v3713_v39  ;;  %v2983_v39 = vld [vmem:[%s2871_s8] ss:$0 sm:$0xff] }
 0x8f6   :  { %v3717_v40 = vpack.c.bf16 %v1770_v42, %v1769_v63  ;;  %v1753_v10 = vadd.f32 %v1752_v8, %v1634_v0 }
 0x8f7   :  { %v1772_v11 = vmax.f32 %v1758_v7, 0.0 }
 0x8f8   :  { %v1771_v13 = vmax.f32 %v1753_v10, 0.0  ;;  %3718 = vmatprep.subr.bf16.mxu0 %v3717_v40 }
 0x8f9   :  { %3720 = vmatpush3.bf16.msra.mxu0 %v3717_v40 }
 0x8fa   :  { %v3721_v9 = vpack.c.bf16 %v1772_v11, %v1771_v13 }
 0x8fc   :  { %3722 = vmatprep.subr.bf16.mxu0 %v3721_v9 }
 0x8fd   :  { %3724 = vmatpush3.bf16.msra.mxu0 %v3721_v9 }
 0x900   :  { %3476 = vmatmul.mubr.msk.f32.vlgmr.msra.gmra.mrb[28].mxu0 %vm574_vm2, %v4095_v3  ;;  %v2075_v3 = vld [vmem:[%s2867_s14] sm:$0xff]  ;;  %s3919_s14 = smov 32  }
 0x901   :  { %3478 = vmatprep.mubr.msk.f32.mxu0 %vm574_vm2, %v4098_v6  ;;  %v3741_v6 = vpack.c.bf16 %v2076_v55, %v2075_v3  ;;  %s2873_s17 = sld [smem:[%s4528_s0 + %s3919_s14]]  }
 0x903   :  { %3742 = vmatprep.subr.bf16.mxu0 %v3741_v6 }
 0x904   :  { %3479 = vmatmul.mubr.msk.f32.gmra.mrb[30].mxu0 %vm574_vm2, %v4105_v61  ;;  %v1968_v61 = vld [vmem:[%s2866_s9 + $0x10] sm:$0xff]  ;;  %s3918_s9 = smov 31  }
 0x905   :  { %3744 = vmatpush3.bf16.msra.mxu0 %v3741_v6  ;;  %v3737_v54 = vpack.c.bf16 %v1969_v53, %v1968_v61  ;;  %s2872_s12 = sld [smem:[%s4528_s0 + %s3918_s9]]  }
 0x906   :  { %3746 = vmatprep.subr.bf16.mxu0 %v3745_v29 }
 0x90b   :  { %v2984_v44 = vld [vmem:[%s2872_s12] ss:$0 sm:$0xff] }
 0x9d3   :  { %v3477_v19 = vpop.f32.mrb[28].mxu0 }
 0x9d4   :  { %v1839_v15 = vpop.f32.mrb[29].mxu0 }
 0x9d5   :  { %3489 = vmatprep.mubr.msk.f32.mxu1 %vm400_vm1, %v1839_v15 }
 0x9d6   :  { %3490 = vmatmul.mubr.msk.f32.vlgmr.msra.gmra.mrb[36].mxu1 %vm400_vm1, %v3477_v19 }
 0x9d7   :  { %v3480_v16 = vpop.f32.mrb[30].mxu0  ;;  %3736 = vmatpush3.bf16.msra.mxu1 %v3733_v14 }
 0x9d8   :  { %v1849_v17 = vpop.f32.mrb[31].mxu0  ;;  %3738 = vmatprep.subr.bf16.mxu1 %v3737_v54 }
 0x9d9   :  { %3492 = vmatprep.mubr.msk.f32.mxu1 %vm400_vm1, %v1849_v17 }
 0x9da   :  { %3493 = vmatmul.mubr.msk.f32.gmra.mrb[38].mxu1 %vm400_vm1, %v3480_v16 }
 0x9db   :  { %3740 = vmatpush3.bf16.msra.mxu1 %v3737_v54  ;;  %3503 = vmatprep.mubr.msk.f32.mxu1 %vm400_vm1, %v4254_v49 }
 0x9de   :  { %3504 = vmatmul.mubr.msk.f32.vlgmr.msra.gmra.mrb[36].mxu1 %vm400_vm1, %v4252_v32 }
 0x9df   :  { %3506 = vmatprep.mubr.msk.f32.mxu1 %vm400_vm1, %v4260_v60 }
 0x9e2   :  { %3507 = vmatmul.mubr.msk.f32.gmra.mrb[38].mxu1 %vm400_vm1, %v4258_v58 }
 0x9e3   :  { %3537 = vmatprep.mubr.msk.f32.mxu1 %vm400_vm1, %v3875_v52  ;;  %v177_v52 = vld [vmem:[%s4367_s30 + $0x8] sm:$0xff] }
 0xab1   :  { %v3505_v22 = vpop.f32.mrb[36].mxu1 }
 0xab2   :  { %v3773_v49 = vadd.f32 %v3505_v22, %v2964_v20  ;;  %v2048_v45 = vpop.f32.mrb[37].mxu1  ;;  %v3876_v22 = vld [vmem:[%s3937_s13 + $0x8] sm:$0xff] }
 0xab3   :  { %v3774_v28 = vadd.f32 %v2964_v20, %v2048_v45  ;;  %v179_v45 = vld [vmem:[%s4367_s30 + $0x18] sm:$0xff] }
 0xab4   :  { %v2072_v60 = vmax.f32 %v3773_v49, 0.0  ;;  %v3877_v49 = vld [vmem:[%s3937_s13 + $0x10] sm:$0xff] }
 0xab5   :  { %v2071_v32 = vmax.f32 %v3774_v28, 0.0  ;;  %v3508_v57 = vpop.f32.mrb[38].mxu1  ;;  %v180_v28 = vld [vmem:[%s4367_s30 + $0x20] sm:$0xff] }
 0xab6   :  { %v3775_v30 = vadd.f32 %v3508_v57, %v2964_v20  ;;  %v2058_v23 = vpop.f32.mrb[39].mxu1  ;;  %v3879_v57 = vld [vmem:[%s3937_s13 + $0x20] sm:$0xff] }
 0xab7   :  { %v3776_v58 = vadd.f32 %v2964_v20, %v2058_v23  ;;  %3513 = vmatprep.mubr.msk.f32.mxu0 %vm2084_vm3, %v2071_v32  ;;  %v178_v20 = vld [vmem:[%s4367_s30 + $0x10] sm:$0xff]  ;;  %v3878_v32 = vld [vmem:[%s3937_s13 + $0x18] sm:$0xff]  ;;  %v3880_v23 = vld [vmem:[%s3937_s13 + $0x28] sm:$0xff] }
 0xab8   :  { %3514 = vmatmul.mubr.msk.f32.vlgmr.msra.gmra.mrb[32].mxu0 %vm2084_vm3, %v2072_v60  ;;  %v2074_v21 = vmax.f32 %v3775_v30, 0.0  ;;  %v181_v60 = vld [vmem:[%s4367_s30 + $0x28] sm:$0xff]  ;;  %v182_v30 = vld [vmem:[%s4367_s30 + $0x30] sm:$0xff] }
 0xab9   :  { %v2073_v59 = vmax.f32 %v3776_v58, 0.0  ;;  %3748 = vmatpush3.bf16.msra.mxu0 %v3745_v29  ;;  %v3881_v58 = vld [vmem:[%s3937_s13 + $0x30] sm:$0xff]  ;;  %v185_v29 = vld [vmem:[%s4367_s30 + $0x48] sm:$0xff] }
 0xabb   :  { %3516 = vmatprep.mubr.msk.f32.mxu0 %vm2084_vm3, %v2073_v59  ;;  %v183_v59 = vld [vmem:[%s4367_s30 + $0x38] sm:$0xff] }
 0xabc   :  { %3517 = vmatmul.mubr.msk.f32.gmra.mrb[34].mxu0 %vm2084_vm3, %v2074_v21  ;;  %v184_v21 = vld [vmem:[%s4367_s30 + $0x40] sm:$0xff] }
 0xb8b   :  { %v3515_v31 = vpop.f32.mrb[32].mxu0 }
 0xb8c   :  { %v2169_v1 = vadd.f32 %v3515_v31, %v2973_v27  ;;  %v2163_v33 = vpop.f32.mrb[33].mxu0  ;;  %v3884_v31 = vld [vmem:[%s3937_s13 + $0x48] sm:$0xff] }
 0xb8d   :  { %v2164_v46 = vadd.f32 %v2973_v27, %v2163_v33  ;;  %v187_v33 = vld [vmem:[%s4367_s30 + $0x58] sm:$0xff] }
 0xb8e   :  { %v2183_v47 = vmul.f32 0.01, %v2169_v1 }
 0xb8f   :  { %v2182_v4 = vmul.f32 0.01, %v2164_v46  ;;  %v3518_v48 = vpop.f32.mrb[34].mxu0 }
 0xb90   :  { %v2179_v5 = vadd.f32 %v3518_v48, %v2973_v27  ;;  %v2173_v56 = vpop.f32.mrb[35].mxu0  ;;  %v2187_v62 = vmax.f32 %v2169_v1, %v2183_v47  ;;  %v3885_v1 = vld [vmem:[%s3937_s13 + $0x50] sm:$0xff]  ;;  %v4430_v47 = vld [vmem:[%s2873_s17] ss:$0 sm:$0xff] }
 0xb91   :  { %v2186_v50 = vmax.f32 %v2164_v46, %v2182_v4  ;;  %v2174_v51 = vadd.f32 %v2973_v27, %v2173_v56  ;;  %v186_v27 = vld [vmem:[%s4367_s30 + $0x50] sm:$0xff]  ;;  %v3886_v46 = vld [vmem:[%s3937_s13 + $0x58] sm:$0xff]  ;;  %v4432_v4 = vld [vmem:[%s2874_s21] ss:$0 sm:$0xff]  ;;  %s3921_s13 = smov 34  }
 0xb92   :  { %v2185_v18 = vmul.f32 0.01, %v2179_v5  ;;  %s2875_s24 = sld [smem:[%s4528_s0 + %s3921_s13]]  }
 0xb93   :  { %v2184_v34 = vmul.f32 0.01, %v2174_v51  ;;  %3523 = vmatprep.mubr.msk.f32.mxu0 %vm2084_vm3, %v2186_v50 }
 0xb94   :  { %3524 = vmatmul.mubr.msk.f32.vlgmr.msra.gmra.mrb[36].mxu0 %vm2084_vm3, %v2187_v62  ;;  %v2189_v36 = vmax.f32 %v2179_v5, %v2185_v18 }
 0xb95   :  { %v2188_v35 = vmax.f32 %v2174_v51, %v2184_v34 }
 0xb97   :  { %3526 = vmatprep.mubr.msk.f32.mxu0 %vm2084_vm3, %v2188_v35 }
 0xb98   :  { %3527 = vmatmul.mubr.msk.f32.gmra.mrb[38].mxu0 %vm2084_vm3, %v2189_v36 }
 0xb99   :  { %3563 = vmatprep.mubr.msk.f32.mxu0 %vm400_vm1, %v176_v26 }
 0xc67   :  { %v3525_v38 = vpop.f32.mrb[36].mxu0 }
 0xc68   :  { %v2283_v41 = vadd.f32 %v3525_v38, %v2978_v37  ;;  %v2277_v42 = vpop.f32.mrb[37].mxu0 }
 0xc69   :  { %v2278_v63 = vadd.f32 %v2978_v37, %v2277_v42 }
 0xc6a   :  { %v2304_v2 = vmul.f32 %v2983_v39, %v2283_v41 }
 0xc6b   :  { %v2303_v0 = vmul.f32 %v2983_v39, %v2278_v63  ;;  %v3528_v7 = vpop.f32.mrb[38].mxu0 }
 0xc6c   :  { %v2315_v8 = vadd.f32 %v2984_v44, %v2304_v2  ;;  %v2293_v40 = vadd.f32 %v3528_v7, %v2978_v37  ;;  %v2287_v10 = vpop.f32.mrb[39].mxu0 }
 0xc6d   :  { %v2314_v11 = vadd.f32 %v2984_v44, %v2303_v0  ;;  %v2288_v13 = vadd.f32 %v2978_v37, %v2287_v10 }
 0xc6e   :  { %v2319_v9 = vmul.f32 0.01, %v2315_v8  ;;  %v2306_v43 = vmul.f32 %v2983_v39, %v2293_v40 }
 0xc6f   :  { %v2318_v12 = vmul.f32 0.01, %v2314_v11  ;;  %v2305_v14 = vmul.f32 %v2983_v39, %v2288_v13 }
 0xc70   :  { %v2323_v3 = vmax.f32 %v2315_v8, %v2319_v9  ;;  %v2317_v55 = vadd.f32 %v2984_v44, %v2306_v43  ;;  %v76_v9 = vstv %s2875_s24 }
 0xc71   :  { %v2322_v6 = vmax.f32 %v2314_v11, %v2318_v12  ;;  %v2316_v61 = vadd.f32 %v2984_v44, %v2305_v14  ;;  %77 = vst [vmem:[#allocation2] sm:$0x1] %v76_v9 }
 0xc72   :  { %v2321_v53 = vmul.f32 0.01, %v2317_v55 }
 0xc73   :  { %v2320_v19 = vmul.f32 0.01, %v2316_v61  ;;  %v3749_v15 = vpack.c.bf16 %v2323_v3, %v2322_v6 }
 0xc74   :  { %v2325_v54 = vmax.f32 %v2317_v55, %v2321_v53 }
 0xc75   :  { %v2324_v16 = vmax.f32 %v2316_v61, %v2320_v19  ;;  %3750 = vmatprep.subr.bf16.mxu1 %v3749_v15  ;;  %3758 = vmatprep.subr.bf16.mxu0 %v3749_v15 }
 0xc76   :  { %3752 = vmatpush3.bf16.msra.mxu1 %v3749_v15  ;;  %3760 = vmatpush3.bf16.msra.mxu0 %v3749_v15 }
 0xc77   :  { %v3753_v17 = vpack.c.bf16 %v2325_v54, %v2324_v16 }
 0xc79   :  { %3754 = vmatprep.subr.bf16.mxu1 %v3753_v17  ;;  %3762 = vmatprep.subr.bf16.mxu0 %v3753_v17 }
 0xc7a   :  { %3756 = vmatpush3.bf16.msra.mxu1 %v3753_v17  ;;  %3764 = vmatpush3.bf16.msra.mxu0 %v3753_v17 }
 0xc7d   :  { %3538 = vmatmul.mubr.msk.f32.vlgmr.msra.gmra.mrb[40].mxu1 %vm400_vm1, %v3876_v22  ;;  %3564 = vmatmul.mubr.msk.f32.vlgmr.msra.gmra.mrb[40].mxu0 %vm400_vm1, %v177_v52 }
 0xc7e   :  { %3540 = vmatprep.mubr.msk.f32.mxu1 %vm400_vm1, %v3877_v49  ;;  %3566 = vmatprep.mubr.msk.f32.mxu0 %vm400_vm1, %v178_v20 }
 0xc81   :  { %3541 = vmatmul.mubr.msk.f32.gmra.mrb[42].mxu1 %vm400_vm1, %v3878_v32  ;;  %3567 = vmatmul.mubr.msk.f32.gmra.mrb[42].mxu0 %vm400_vm1, %v179_v45 }
 0xc82   :  { %3543 = vmatprep.mubr.msk.f32.mxu1 %vm400_vm1, %v3879_v57  ;;  %3569 = vmatprep.mubr.msk.f32.mxu0 %vm400_vm1, %v180_v28 }
 0xc85   :  { %3544 = vmatmul.mubr.msk.f32.gmra.mrb[44].mxu1 %vm400_vm1, %v3880_v23  ;;  %3570 = vmatmul.mubr.msk.f32.gmra.mrb[44].mxu0 %vm400_vm1, %v181_v60 }
 0xc86   :  { %3546 = vmatprep.mubr.msk.f32.mxu1 %vm400_vm1, %v3881_v58  ;;  %3572 = vmatprep.mubr.msk.f32.mxu0 %vm400_vm1, %v182_v30 }
 0xc89   :  { %3547 = vmatmul.mubr.msk.f32.gmra.mrb[46].mxu1 %vm400_vm1, %v3882_v24  ;;  %3573 = vmatmul.mubr.msk.f32.gmra.mrb[46].mxu0 %vm400_vm1, %v183_v59 }
 0xc8a   :  { %3549 = vmatprep.mubr.msk.f32.mxu1 %vm400_vm1, %v3883_v25  ;;  %3575 = vmatprep.mubr.msk.f32.mxu0 %vm400_vm1, %v184_v21 }
 0xc8d   :  { %3550 = vmatmul.mubr.msk.f32.gmra.mrb[48].mxu1 %vm400_vm1, %v3884_v31  ;;  %3576 = vmatmul.mubr.msk.f32.gmra.mrb[48].mxu0 %vm400_vm1, %v185_v29 }
 0xc8e   :  { %3552 = vmatprep.mubr.msk.f32.mxu1 %vm400_vm1, %v3885_v1  ;;  %3578 = vmatprep.mubr.msk.f32.mxu0 %vm400_vm1, %v186_v27 }
 0xc91   :  { %3553 = vmatmul.mubr.msk.f32.gmra.mrb[50].mxu1 %vm400_vm1, %v3886_v46  ;;  %3579 = vmatmul.mubr.msk.f32.gmra.mrb[50].mxu0 %vm400_vm1, %v187_v33 }
 0xd50   :  { %v3539_v48 = vpop.f32.mrb[40].mxu1  ;;  %v3565_v5 = vpop.f32.mrb[40].mxu0 }
 0xd51   :  { %v2620_v56 = vmul.f32 %v3539_v48, %v4430_v47  ;;  %v2675_v50 = vmul.f32 %v3565_v5, %v4432_v4  ;;  %v2553_v51 = vpop.f32.mrb[41].mxu0  ;;  %v2392_v62 = vpop.f32.mrb[41].mxu1 }
 0xd52   :  { %v2619_v18 = vmul.f32 %v4430_v47, %v2392_v62  ;;  %v2674_v34 = vmul.f32 %v4432_v4, %v2553_v51 }
 0xd53   :  { %v2689_v35 = vsel %vm400_vm1, %v2675_v50, 0.0  ;;  %v2634_v36 = vsel %vm400_vm1, %v2620_v56, 0.0 }
 0xd54   :  { %2690 = vadd.xlane.f32.xlu0 %v2689_v35  ;;  %2635 = vadd.xlane.f32.xlu1 %v2634_v36  ;;  %v3542_v26 = vpop.f32.mrb[42].mxu1  ;;  %v3568_v37 = vpop.f32.mrb[42].mxu0  ;;  %v2631_v38 = vsel %vm400_vm1, %v2619_v18, 0.0  ;;  %v2686_v63 = vsel %vm400_vm1, %v2674_v34, 0.0 }
 0xd55   :  { %v2622_v39 = vmul.f32 %v3542_v26, %v4430_v47  ;;  %v2402_v41 = vpop.f32.mrb[43].mxu1  ;;  %v2563_v42 = vpop.f32.mrb[43].mxu0  ;;  %v2677_v7 = vmul.f32 %v3568_v37, %v4432_v4 }
 0xd56   :  { %v2676_v44 = vmul.f32 %v4432_v4, %v2563_v42  ;;  %v2621_v53 = vmul.f32 %v4430_v47, %v2402_v41 }
 0xd57   :  { %v2640_v8 = vsel %vm400_vm1, %v2622_v39, 0.0  ;;  %v2695_v14 = vsel %vm400_vm1, %v2677_v7, 0.0 }
 0xd58   :  { %2687 = vadd.xlane.f32.xlu1 %v2686_v63  ;;  %2632 = vadd.xlane.f32.xlu0 %v2631_v38  ;;  %v3545_v2 = vpop.f32.mrb[44].mxu1  ;;  %v3571_v0 = vpop.f32.mrb[44].mxu0  ;;  %v2692_v40 = vsel %vm400_vm1, %v2676_v44, 0.0  ;;  %v2637_v22 = vsel %vm400_vm1, %v2621_v53, 0.0  ;;  %v4485_v38 = vld [vmem:[#allocation2] ss:$0 sm:$0xff] }
 0xd59   :  { %v2412_v10 = vpop.f32.mrb[45].mxu1  ;;  %v2573_v11 = vpop.f32.mrb[45].mxu0  ;;  %v2624_v54 = vmul.f32 %v3545_v2, %v4430_v47  ;;  %v2679_v28 = vmul.f32 %v3571_v0, %v4432_v4 }
 0xd5a   :  { %v2623_v13 = vmul.f32 %v4430_v47, %v2412_v10  ;;  %v2678_v3 = vmul.f32 %v4432_v4, %v2573_v11 }
 0xd5b   :  { %v2646_v32 = vsel %vm400_vm1, %v2624_v54, 0.0  ;;  %v2701_v59 = vsel %vm400_vm1, %v2679_v28, 0.0 }
 0xd5c   :  { %2641 = vadd.xlane.f32.xlu0 %v2640_v8  ;;  %2693 = vadd.xlane.f32.xlu1 %v2692_v40  ;;  %v3548_v43 = vpop.f32.mrb[46].mxu1  ;;  %v3574_v12 = vpop.f32.mrb[46].mxu0  ;;  %v2643_v55 = vsel %vm400_vm1, %v2623_v13, 0.0  ;;  %v2698_v16 = vsel %vm400_vm1, %v2678_v3, 0.0 }
 0xd5d   :  { %v2422_v6 = vpop.f32.mrb[47].mxu1  ;;  %v2583_v61 = vpop.f32.mrb[47].mxu0  ;;  %v2626_v58 = vmul.f32 %v3548_v43, %v4430_v47  ;;  %v2681_v25 = vmul.f32 %v3574_v12, %v4432_v4 }
 0xd5e   :  { %v2625_v17 = vmul.f32 %v4430_v47, %v2422_v6  ;;  %v2680_v57 = vmul.f32 %v4432_v4, %v2583_v61 }
 0xd5f   :  { %v2652_v29 = vsel %vm400_vm1, %v2626_v58, 0.0  ;;  %v2707_v33 = vsel %vm400_vm1, %v2681_v25, 0.0 }
 0xd60   :  { %2696 = vadd.xlane.f32.xlu0 %v2695_v14  ;;  %2644 = vadd.xlane.f32.xlu1 %v2643_v55  ;;  %v3551_v19 = vpop.f32.mrb[48].mxu1  ;;  %v3577_v15 = vpop.f32.mrb[48].mxu0  ;;  %v2649_v60 = vsel %vm400_vm1, %v2625_v17, 0.0  ;;  %v2704_v21 = vsel %vm400_vm1, %v2680_v57, 0.0 }
 0xd61   :  { %v2432_v52 = vpop.f32.mrb[49].mxu1  ;;  %v2593_v20 = vpop.f32.mrb[49].mxu0  ;;  %v2628_v1 = vmul.f32 %v3551_v19, %v4430_v47  ;;  %v2683_v5 = vmul.f32 %v3577_v15, %v4432_v4 }
 0xd62   :  { %v2627_v24 = vmul.f32 %v4430_v47, %v2432_v52  ;;  %v2682_v27 = vmul.f32 %v4432_v4, %v2593_v20 }
 0xd63   :  { %v2658_v56 = vsel %vm400_vm1, %v2628_v1, 0.0  ;;  %v2713_v18 = vsel %vm400_vm1, %v2683_v5, 0.0 }
 0xd64   :  { %2638 = vadd.xlane.f32.xlu0 %v2637_v22  ;;  %2699 = vadd.xlane.f32.xlu1 %v2698_v16  ;;  %v3554_v49 = vpop.f32.mrb[50].mxu1  ;;  %v3580_v45 = vpop.f32.mrb[50].mxu0  ;;  %v2655_v31 = vsel %vm400_vm1, %v2627_v24, 0.0  ;;  %v2710_v46 = vsel %vm400_vm1, %v2682_v27, 0.0 }
 0xd65   :  { %v2442_v30 = vpop.f32.mrb[51].mxu1  ;;  %v2603_v23 = vpop.f32.mrb[51].mxu0  ;;  %v2630_v62 = vmul.f32 %v3554_v49, %v4430_v47  ;;  %v2685_v35 = vmul.f32 %v3580_v45, %v4432_v4 }
 0xd66   :  { %v2629_v48 = vmul.f32 %v4430_v47, %v2442_v30  ;;  %v2684_v50 = vmul.f32 %v4432_v4, %v2603_v23 }
 0xd67   :  { %v2664_v36 = vsel %vm400_vm1, %v2630_v62, 0.0  ;;  %v2719_v26 = vsel %vm400_vm1, %v2685_v35, 0.0 }
 0xd68   :  { %2647 = vadd.xlane.f32.xlu0 %v2646_v32  ;;  %2650 = vadd.xlane.f32.xlu1 %v2649_v60  ;;  %v2661_v51 = vsel %vm400_vm1, %v2629_v48, 0.0  ;;  %v2716_v34 = vsel %vm400_vm1, %v2684_v50, 0.0 }
 0xd6c   :  { %2702 = vadd.xlane.f32.xlu0 %v2701_v59  ;;  %2705 = vadd.xlane.f32.xlu1 %v2704_v21 }
 0xd70   :  { %2653 = vadd.xlane.f32.xlu0 %v2652_v29  ;;  %2656 = vadd.xlane.f32.xlu1 %v2655_v31 }
 0xd74   :  { %2708 = vadd.xlane.f32.xlu0 %v2707_v33  ;;  %2711 = vadd.xlane.f32.xlu1 %v2710_v46 }
 0xd78   :  { %2659 = vadd.xlane.f32.xlu0 %v2658_v56  ;;  %2662 = vadd.xlane.f32.xlu1 %v2661_v51 }
 0xd7c   :  { %2714 = vadd.xlane.f32.xlu0 %v2713_v18  ;;  %2717 = vadd.xlane.f32.xlu1 %v2716_v34 }
 0xd80   :  { %2665 = vadd.xlane.f32.xlu0 %v2664_v36 }
 0xd84   :  { %2720 = vadd.xlane.f32.xlu0 %v2719_v26 }
 0xde1   :  { %v2691_v37 = vpop.xlane.xlu0 %2690  ;;  %v2636_v39 = vpop.xlane.xlu1 %2635 }
 0xde2   :  { %v2723_v41 = vadd.f32 %v2691_v37, %v2636_v39 }
 0xde4   :  { %v2742_v47 = vadd.f32 %v4485_v38, %v2723_v41 }
 0xde5   :  { %v2688_v42 = vpop.xlane.xlu1 %2687  ;;  %v2633_v44 = vpop.xlane.xlu0 %2632 }
 0xde6   :  { %v2754_v63 = vsub.f32 0.0, %v2742_v47  ;;  %v2722_v2 = vadd.f32 %v2688_v42, %v2633_v44 }
 0xde8   :  { %v2767_v0 = vmul.f32 1.442695, %v2754_v63  ;;  %v2741_v4 = vadd.f32 %v4485_v38, %v2722_v2 }
 0xde9   :  { %v2642_v7 = vpop.xlane.xlu0 %2641  ;;  %v2694_v8 = vpop.xlane.xlu1 %2693 }
 0xdea   :  { %3827 = vpow2.f32 %v2767_v0  ;;  %v2753_v40 = vsub.f32 0.0, %v2741_v4 }
 0xdec   :  { %v2765_v10 = vmul.f32 1.442695, %v2753_v40 }
 0xded   :  { %v2697_v11 = vpop.xlane.xlu0 %2696  ;;  %v2645_v13 = vpop.xlane.xlu1 %2644 }
 0xdee   :  { %3829 = vpow2.f32 %v2765_v10  ;;  %v2725_v9 = vadd.f32 %v2697_v11, %v2642_v7 }
 0xdf0   :  { %v2744_v43 = vadd.f32 %v4485_v38, %v2725_v9 }
 0xdf1   :  { %v2639_v12 = vpop.xlane.xlu0 %2638  ;;  %v2700_v14 = vpop.xlane.xlu1 %2699 }
 0xdf2   :  { %v2756_v3 = vsub.f32 0.0, %v2744_v43  ;;  %v2724_v55 = vadd.f32 %v2694_v8, %v2639_v12  ;;  %v2726_v6 = vadd.f32 %v2700_v14, %v2645_v13 }
 0xdf4   :  { %v3828_v61 = vpop.eup %3827  ;;  %v2771_v53 = vmul.f32 1.442695, %v2756_v3  ;;  %v2743_v19 = vadd.f32 %v4485_v38, %v2724_v55  ;;  %v2745_v15 = vadd.f32 %v4485_v38, %v2726_v6 }
 0xdf5   :  { %v2790_v54 = vadd.f32 1.0, %v3828_v61  ;;  %v2648_v16 = vpop.xlane.xlu0 %2647  ;;  %v2651_v17 = vpop.xlane.xlu1 %2650 }
 0xdf6   :  { %3831 = vpow2.f32 %v2771_v53  ;;  %v2755_v52 = vsub.f32 0.0, %v2743_v19  ;;  %v2757_v20 = vsub.f32 0.0, %v2745_v15 }
 0xdf7   :  { %3833 = vrcp.f32 %v2790_v54 }
 0xdf8   :  { %v3830_v22 = vpop.eup %3829  ;;  %v2769_v49 = vmul.f32 1.442695, %v2755_v52  ;;  %v2773_v45 = vmul.f32 1.442695, %v2757_v20 }
 0xdf9   :  { %v2789_v28 = vadd.f32 1.0, %v3830_v22  ;;  %v2703_v32 = vpop.xlane.xlu0 %2702  ;;  %v2706_v57 = vpop.xlane.xlu1 %2705 }
 0xdfa   :  { %3835 = vpow2.f32 %v2769_v49  ;;  %v2727_v60 = vadd.f32 %v2703_v32, %v2648_v16  ;;  %v2728_v30 = vadd.f32 %v2706_v57, %v2651_v17 }
 0xdfb   :  { %3837 = vrcp.f32 %v2789_v28 }
 0xdfc   :  { %3839 = vpow2.f32 %v2773_v45  ;;  %v2746_v23 = vadd.f32 %v4485_v38, %v2727_v60  ;;  %v2747_v58 = vadd.f32 %v4485_v38, %v2728_v30 }
 0xdfd   :  { %v2654_v59 = vpop.xlane.xlu0 %2653  ;;  %v2657_v21 = vpop.xlane.xlu1 %2656 }
 0xdfe   :  { %v2758_v24 = vsub.f32 0.0, %v2746_v23  ;;  %v2759_v25 = vsub.f32 0.0, %v2747_v58 }
 0xe00   :  { %v3832_v29 = vpop.eup %3831  ;;  %v2775_v27 = vmul.f32 1.442695, %v2758_v24  ;;  %v2777_v31 = vmul.f32 1.442695, %v2759_v25 }
 0xe01   :  { %v3834_v1 = vpop.eup %3833  ;;  %v2792_v33 = vadd.f32 1.0, %v3832_v29  ;;  %v2709_v46 = vpop.xlane.xlu0 %2708 }
 0xe02   :  { %v2712_v48 = vpop.xlane.xlu1 %2711  ;;  %2827 = vst.msk [vmem:[%s4495_s28 + $0x8] sm:$0xff] %vm2825_vm4, %v3834_v1  ;;  %3841 = vpow2.f32 %v2775_v27  ;;  %v2729_v5 = vadd.f32 %v2709_v46, %v2654_v59 }
 0xe03   :  { %v2730_v56 = vadd.f32 %v2712_v48, %v2657_v21  ;;  %3843 = vrcp.f32 %v2792_v33 }
 0xe04   :  { %v3836_v50 = vpop.eup %3835  ;;  %3845 = vpow2.f32 %v2777_v31  ;;  %v2748_v51 = vadd.f32 %v4485_v38, %v2729_v5 }
 0xe05   :  { %v2749_v62 = vadd.f32 %v4485_v38, %v2730_v56  ;;  %v3838_v18 = vpop.eup %3837  ;;  %v2791_v34 = vadd.f32 1.0, %v3836_v50  ;;  %v2660_v35 = vpop.xlane.xlu0 %2659 }
 0xe06   :  { %v2663_v36 = vpop.xlane.xlu1 %2662  ;;  %v3840_v26 = vpop.eup %3839  ;;  %2826 = vst.msk [vmem:[%s4495_s28] sm:$0xff] %vm2825_vm4, %v3838_v18  ;;  %v2760_v37 = vsub.f32 0.0, %v2748_v51 }
 0xe07   :  { %v2761_v39 = vsub.f32 0.0, %v2749_v62  ;;  %3847 = vrcp.f32 %v2791_v34  ;;  %v2793_v41 = vadd.f32 1.0, %v3840_v26 }
 0xe08   :  { %v2779_v47 = vmul.f32 1.442695, %v2760_v37 }
 0xe09   :  { %v2781_v42 = vmul.f32 1.442695, %v2761_v39  ;;  %3849 = vrcp.f32 %v2793_v41  ;;  %v2715_v44 = vpop.xlane.xlu0 %2714 }
 0xe0a   :  { %v2718_v63 = vpop.xlane.xlu1 %2717  ;;  %3851 = vpow2.f32 %v2779_v47  ;;  %v2731_v2 = vadd.f32 %v2715_v44, %v2660_v35 }
 0xe0b   :  { %v2732_v0 = vadd.f32 %v2718_v63, %v2663_v36  ;;  %3853 = vpow2.f32 %v2781_v42 }
 0xe0c   :  { %v3842_v4 = vpop.eup %3841  ;;  %v2750_v7 = vadd.f32 %v4485_v38, %v2731_v2 }
 0xe0d   :  { %v2751_v8 = vadd.f32 %v4485_v38, %v2732_v0  ;;  %v3844_v40 = vpop.eup %3843  ;;  %v2794_v10 = vadd.f32 1.0, %v3842_v4  ;;  %v2666_v11 = vpop.xlane.xlu0 %2665 }
 0xe0e   :  { %v3846_v13 = vpop.eup %3845  ;;  %2829 = vst.msk [vmem:[%s4495_s28 + $0x18] sm:$0xff] %vm2825_vm4, %v3844_v40  ;;  %v2762_v9 = vsub.f32 0.0, %v2750_v7 }
 0xe0f   :  { %v2763_v43 = vsub.f32 0.0, %v2751_v8  ;;  %3855 = vrcp.f32 %v2794_v10  ;;  %v2795_v12 = vadd.f32 1.0, %v3846_v13 }
 0xe10   :  { %v2783_v14 = vmul.f32 1.442695, %v2762_v9 }
 0xe11   :  { %v2785_v3 = vmul.f32 1.442695, %v2763_v43  ;;  %v3848_v55 = vpop.eup %3847  ;;  %3857 = vrcp.f32 %v2795_v12  ;;  %v2721_v6 = vpop.xlane.xlu0 %2720 }
 0xe12   :  { %2828 = vst.msk [vmem:[%s4495_s28 + $0x10] sm:$0xff] %vm2825_vm4, %v3848_v55  ;;  %3859 = vpow2.f32 %v2783_v14  ;;  %v2733_v61 = vadd.f32 %v2721_v6, %v2666_v11 }
 0xe13   :  { %v3850_v53 = vpop.eup %3849  ;;  %3861 = vpow2.f32 %v2785_v3 }
 0xe14   :  { %v3852_v19 = vpop.eup %3851  ;;  %2830 = vst.msk [vmem:[%s4495_s28 + $0x20] sm:$0xff] %vm2825_vm4, %v3850_v53  ;;  %v2752_v15 = vadd.f32 %v4485_v38, %v2733_v61 }
 0xe15   :  { %v3854_v54 = vpop.eup %3853  ;;  %v2796_v16 = vadd.f32 1.0, %v3852_v19 }
 0xe16   :  { %v2797_v17 = vadd.f32 1.0, %v3854_v54  ;;  %v2764_v52 = vsub.f32 0.0, %v2752_v15 }
 0xe17   :  { %3863 = vrcp.f32 %v2796_v16 }
 0xe18   :  { %3865 = vrcp.f32 %v2797_v17  ;;  %v2787_v20 = vmul.f32 1.442695, %v2764_v52 }
 0xe19   :  { %v3856_v22 = vpop.eup %3855 }
 0xe1a   :  { %2831 = vst.msk [vmem:[%s4495_s28 + $0x28] sm:$0xff] %vm2825_vm4, %v3856_v22  ;;  %3867 = vpow2.f32 %v2787_v20 }
 0xe1b   :  { %v3858_v49 = vpop.eup %3857 }
 0xe1c   :  { %v3860_v45 = vpop.eup %3859  ;;  %2832 = vst.msk [vmem:[%s4495_s28 + $0x30] sm:$0xff] %vm2825_vm4, %v3858_v49 }
 0xe1d   :  { %v3862_v38 = vpop.eup %3861  ;;  %v2798_v28 = vadd.f32 1.0, %v3860_v45 }
 0xe1e   :  { %v2799_v32 = vadd.f32 1.0, %v3862_v38 }
 0xe1f   :  { %3869 = vrcp.f32 %v2798_v28 }
 0xe20   :  { %3871 = vrcp.f32 %v2799_v32 }
 0xe21   :  { %v3864_v57 = vpop.eup %3863 }
 0xe22   :  { %v3866_v60 = vpop.eup %3865  ;;  %2833 = vst.msk [vmem:[%s4495_s28 + $0x38] sm:$0xff] %vm2825_vm4, %v3864_v57 }
 0xe23   :  { %2834 = vst.msk [vmem:[%s4495_s28 + $0x40] sm:$0xff] %vm2825_vm4, %v3866_v60 }
 0xe24   :  { %v3868_v30 = vpop.eup %3867 }
 0xe25   :  { %v2800_v23 = vadd.f32 1.0, %v3868_v30 }
 0xe27   :  { %3873 = vrcp.f32 %v2800_v23 }
 0xe29   :  { %v3870_v58 = vpop.eup %3869 }
 0xe2a   :  { %v3872_v59 = vpop.eup %3871  ;;  %2835 = vst.msk [vmem:[%s4495_s28 + $0x48] sm:$0xff] %vm2825_vm4, %v3870_v58 }
 0xe2b   :  { %2836 = vst.msk [vmem:[%s4495_s28 + $0x50] sm:$0xff] %vm2825_vm4, %v3872_v59 }
 0xe31   :  { %v3874_v21 = vpop.eup %3873 }
 0xe32   :  { %2837 = vst.msk [vmem:[%s4495_s28 + $0x58] sm:$0xff] %vm2825_vm4, %v3874_v21 }

</bundles_post_ra>
